<compile_context>
chip_gen: v7x
topology: tpu7x:2x2x1
jax: 0.10.0
libtpu: 0.0.40
codegen_flags: <defaults>
</compile_context>

<pallas_src>
import jax
import jax.numpy as jnp
import numpy as np
from jax import lax
from jax.experimental import pallas as pl
from jax.experimental.pallas import tpu as pltpu


def _make_bilstm_kernel(L, Bp, H):
    """L timesteps, Bp padded batch rows per step (multiple of 8), H per-direction hidden."""
    H2 = 2 * H          # [fwd | bwd] hidden width (lane dim of the carry)

    def kernel(x2_ref, wx_ref, wh_ref, b_ref, o_ref, xproj_ref):
        # x2_ref:    (L*Bp, 2D)  row t*Bp+b = [ x[b, t, :] | x[b, L-1-t, :] ]
        # wx_ref:    (2D, 8H)    input weights, gate order [i|f|o|g], fwd/bwd lane-interleaved
        # wh_ref:    (2H, 8H)    block-diagonal recurrent weights, same column layout
        # b_ref:     (1, 8H)     (b_ih + b_hh), same column layout
        # o_ref:     (L*Bp, 2H)  row t*Bp+b = [h_fwd(t) | h_bwd(t)] for sequence b
        # xproj_ref: (L*Bp, 8H)  f32 scratch

        # 1) Fused input projection: every timestep / gate / direction (with the fwd-vs-bwd
        #    time selection already baked into the doubled input) in ONE MXU matmul.
        xproj_ref[...] = (
            jnp.dot(x2_ref[...], wx_ref[...], preferred_element_type=jnp.float32)
            + b_ref[...])

        wh = wh_ref[...]   # hoisted out of the loop; recurrent weights stay resident

        def step(t, carry):
            h, c = carry                                            # (Bp, 2H) f32, [fwd|bwd]
            # Both directions' recurrent matmul in one MXU push (block-diagonal wh).
            gh = jnp.dot(h, wh, preferred_element_type=jnp.float32)  # (Bp, 8H)

            row = t * Bp                                            # 8-sublane aligned (Bp%8==0)
            gates = xproj_ref[pl.ds(row, Bp), :] + gh               # one aligned (8, 8H) vld

            # Gate layout [i|f|o|g]: one sigmoid over 0:6H, one tanh over 6H:8H.
            sig = jax.nn.sigmoid(gates[:, 0:6 * H])                 # (Bp, 6H)  i|f|o
            g = jnp.tanh(gates[:, 6 * H:8 * H])                     # (Bp, 2H)  g
            c = sig[:, 2 * H:4 * H] * c + sig[:, 0:2 * H] * g       # f*c + i*g
            h = sig[:, 4 * H:6 * H] * jnp.tanh(c)                   # o*tanh(c)

            # forward hidden belongs to time t, backward hidden to time L-1-t
            o_ref[pl.ds(row, Bp), pl.ds(0, H)] = h[:, 0:H].astype(o_ref.dtype)
            o_ref[pl.ds((L - 1 - t) * Bp, Bp), pl.ds(H, H)] = h[:, H:H2].astype(o_ref.dtype)
            return h, c

        zeros = jnp.zeros((Bp, H2), jnp.float32)   # initial (h, c) is None -> zeros
        lax.fori_loop(0, L, step, (zeros, zeros), unroll=True)

    return kernel


def lstm_encoding(x, params, *, return_cls=False):
    """Bidirectional LSTM encoding (batch_first), mask=None / lens=None path.

    x: (B, L, D) float32
    params: PyTorch-layout LSTM params per direction:
      w_ih_f (4H, D), w_hh_f (4H, H), b_ih_f (4H,), b_hh_f (4H,), and *_b for backward.
    """
    # TODO(synk): mask/lens packed-sequence path (sort + pack_padded_sequence) not implemented;
    #             full-length sequences only.
    B, L, D = x.shape
    H = params["w_hh_f"].shape[1]

    # --- wrapper-side weight / input re-layout (once, outside the kernel) -------------------
    # PyTorch gate row order is [i|f|g|o]; new column order is [i | f | o | g], with fwd lanes
    # 0:H and bwd lanes H:2H inside each gate block.
    i_sl, f_sl = slice(0, H), slice(H, 2 * H)
    g_sl, o_sl = slice(2 * H, 3 * H), slice(3 * H, 4 * H)
    gate_order = (i_sl, f_sl, o_sl, g_sl)

    wxT_f, wxT_b = params["w_ih_f"].T, params["w_ih_b"].T        # (D, 4H)
    whT_f, whT_b = params["w_hh_f"].T, params["w_hh_b"].T        # (H, 4H)
    bf = params["b_ih_f"] + params["b_hh_f"]
    bb = params["b_ih_b"] + params["b_hh_b"]

    zD = jnp.zeros((D, H), jnp.float32)
    zH = jnp.zeros((H, H), jnp.float32)

    # Input weights act on the doubled input [x_t | x_{L-1-t}]: forward weights read the first
    # D features -> fwd lanes; backward weights read the last D features -> bwd lanes.
    wx = jnp.concatenate(
        [jnp.concatenate([jnp.concatenate([wxT_f[:, q], zD], axis=1),
                          jnp.concatenate([zD, wxT_b[:, q]], axis=1)], axis=0)
         for q in gate_order], axis=1)                            # (2D, 8H)

    wh = jnp.concatenate(
        [jnp.concatenate([jnp.concatenate([whT_f[:, q], zH], axis=1),
                          jnp.concatenate([zH, whT_b[:, q]], axis=1)], axis=0)
         for q in gate_order], axis=1)                            # (2H, 8H)

    b2d = jnp.concatenate(
        [jnp.concatenate([bf[q], bb[q]]) for q in gate_order]).reshape(1, 8 * H)

    # Pad batch to a multiple of 8 so every per-timestep row block is 8-sublane aligned
    # (padded rows are independent in the recurrence and sliced away afterwards).
    Bp = max(8, -(-B // 8) * 8)
    x_pad = jnp.pad(x.astype(jnp.float32), ((0, Bp - B), (0, 0), (0, 0)))

    # time-major flattening; glue the time-reversed copy along lanes for the backward direction
    x_tm = jnp.transpose(x_pad, (1, 0, 2))                        # (L, Bp, D)
    x2 = jnp.concatenate([x_tm, x_tm[::-1]], axis=-1).reshape(L * Bp, 2 * D)
    # TODO(synk): on v6e/v7x cast x2/wx to bf16 here (keep f32 accumulation and f32 recurrence)
    #             once the 1e-3 output tolerance allows.

    LB, D2, G8, H2 = L * Bp, 2 * D, 8 * H, 2 * H

    grid_spec = pltpu.PrefetchScalarGridSpec(
        num_scalar_prefetch=0,
        grid=(1,),   # whole (tiny) problem in one invocation; one DMA per operand
        in_specs=[
            pl.BlockSpec((LB, D2), lambda i: (0, 0)),
            pl.BlockSpec((D2, G8), lambda i: (0, 0)),             # weights VMEM-resident
            pl.BlockSpec((H2, G8), lambda i: (0, 0)),
            pl.BlockSpec((1, G8), lambda i: (0, 0)),
        ],
        out_specs=pl.BlockSpec((LB, H2), lambda i: (0, 0)),
        scratch_shapes=[pltpu.VMEM((LB, G8), jnp.float32)],
    )

    out_flat = pl.pallas_call(
        _make_bilstm_kernel(L, Bp, H),
        out_shape=jax.ShapeDtypeStruct((LB, H2), x.dtype),
        grid_spec=grid_spec,
        compiler_params=pltpu.CompilerParams(
            dimension_semantics=("arbitrary",)),
    )(x2, wx, wh, b2d)

    # (L*Bp, 2H) -> (L, Bp, 2H) -> drop padded rows -> (B, L, 2H)
    outputs = jnp.transpose(out_flat.reshape(L, Bp, 2 * H)[:, :B, :], (1, 0, 2))
    if return_cls:
        # h[-2] = last fwd hidden = outputs[:, -1, :H]; h[-1] = last bwd = outputs[:, 0, H:]
        hidden = jnp.concatenate([outputs[:, -1, :H], outputs[:, 0, H:]], axis=-1)
        return outputs, hidden
    return outputs


def _reference(x, params):
    """Pure-JAX bidirectional LSTM mirroring nn.LSTM(batch_first=True) semantics."""
    H = params["w_hh_f"].shape[1]
    hi = jax.lax.Precision.HIGHEST

    def run_dir(x_dir, w_ih, w_hh, b_ih, b_hh):
        Bsz = x_dir.shape[0]

        def cell(carry, xt):
            h, c = carry
            gates = (jnp.dot(xt, w_ih.T, precision=hi) + b_ih
                     + jnp.dot(h, w_hh.T, precision=hi) + b_hh)
            i = jax.nn.sigmoid(gates[:, 0:H])
            f = jax.nn.sigmoid(gates[:, H:2 * H])
            g = jnp.tanh(gates[:, 2 * H:3 * H])
            o = jax.nn.sigmoid(gates[:, 3 * H:4 * H])
            c = f * c + i * g
            h = o * jnp.tanh(c)
            return (h, c), h

        h0 = jnp.zeros((Bsz, H), jnp.float32)
        (_, _), hs = lax.scan(cell, (h0, h0), jnp.swapaxes(x_dir, 0, 1))
        return jnp.swapaxes(hs, 0, 1)                       # (B, L, H)

    out_f = run_dir(x, params["w_ih_f"], params["w_hh_f"],
                    params["b_ih_f"], params["b_hh_f"])
    out_b = run_dir(x[:, ::-1, :], params["w_ih_b"], params["w_hh_b"],
                    params["b_ih_b"], params["b_hh_b"])[:, ::-1, :]
    return jnp.concatenate([out_f, out_b], axis=-1)


if __name__ == "__main__":
    # Shapes consistent with the module: batch=2, seq=16, hidden_dim=32 -> H=16 per direction.
    B, L, hidden_dim = 2, 16, 32
    input_dim = hidden_dim            # config default: input_dim = hidden_dim
    H = hidden_dim // 2               # bidirectional: per-direction hidden size

    key = jax.random.PRNGKey(0)
    ks = jax.random.split(key, 9)
    bound = 1.0 / np.sqrt(H)          # PyTorch LSTM default init range

    def u(k, shape):
        return jax.random.uniform(k, shape, minval=-bound, maxval=bound, dtype=jnp.float32)

    x = jax.random.normal(ks[0], (B, L, input_dim), dtype=jnp.float32)
    params = {
        "w_ih_f": u(ks[1], (4 * H, input_dim)),
        "w_hh_f": u(ks[2], (4 * H, H)),
        "b_ih_f": u(ks[3], (4 * H,)),
        "b_hh_f": u(ks[4], (4 * H,)),
        "w_ih_b": u(ks[5], (4 * H, input_dim)),
        "w_hh_b": u(ks[6], (4 * H, H)),
        "b_ih_b": u(ks[7], (4 * H,)),
        "b_hh_b": u(ks[8], (4 * H,)),
    }

    out = lstm_encoding(x, params)
    out = jax.block_until_ready(out)

    ref = _reference(x, params)
    np.testing.assert_allclose(np.asarray(out), np.asarray(ref), rtol=1e-3, atol=1e-3)
    print("KERNEL_OK")
</pallas_src>

<mosaic_0001>
module attributes {stable_mosaic.version = 11 : i64} {
  func.func @kernel(%arg0: i32, %arg1: memref<128x64xf32, #tpu.memory_space<vmem>>, %arg2: memref<64x128xf32, #tpu.memory_space<vmem>>, %arg3: memref<32x128xf32, #tpu.memory_space<vmem>>, %arg4: memref<1x128xf32, #tpu.memory_space<vmem>>, %arg5: memref<128x32xf32, #tpu.memory_space<vmem>>, %arg6: memref<128x128xf32, #tpu.memory_space<vmem>>) attributes {dimension_semantics = [#tpu.dimension_semantics<arbitrary>], iteration_bounds = array<i64: 1>, scalar_prefetch = 0 : i64, scratch_operands = 1 : i64, tpu.core_type = #tpu.core_type<tc>, window_params = [{pipeline_mode = #tpu.pipeline_mode<synchronous>, transform_indices = @transform_0, window_bounds = array<i64: 128, 64>}, {pipeline_mode = #tpu.pipeline_mode<synchronous>, transform_indices = @transform_1, window_bounds = array<i64: 64, 128>}, {pipeline_mode = #tpu.pipeline_mode<synchronous>, transform_indices = @transform_2, window_bounds = array<i64: 32, 128>}, {pipeline_mode = #tpu.pipeline_mode<synchronous>, transform_indices = @transform_3, window_bounds = array<i64: 1, 128>}, {pipeline_mode = #tpu.pipeline_mode<synchronous>, transform_indices = @transform_4, window_bounds = array<i64: 128, 32>}]} {
    %c0 = arith.constant 0 : index
    %c0_0 = arith.constant 0 : index
    %0 = vector.load %arg1[%c0, %c0_0] : memref<128x64xf32, #tpu.memory_space<vmem>>, vector<128x64xf32>
    %c0_1 = arith.constant 0 : index
    %c0_2 = arith.constant 0 : index
    %1 = vector.load %arg2[%c0_1, %c0_2] : memref<64x128xf32, #tpu.memory_space<vmem>>, vector<64x128xf32>
    %cst = arith.constant dense<0.000000e+00> : vector<128x128xf32>
    %2 = tpu.matmul %0, %1, %cst {dimension_numbers = #tpu.dot_dimension_numbers<[1], [0], [0], [1], [0, 0, 1, 1], [], []>} : vector<128x64xf32>, vector<64x128xf32>, vector<128x128xf32> -> vector<128x128xf32>
    %c0_3 = arith.constant 0 : index
    %c0_4 = arith.constant 0 : index
    %3 = vector.load %arg4[%c0_3, %c0_4] : memref<1x128xf32, #tpu.memory_space<vmem>>, vector<1x128xf32>
    %4 = vector.broadcast %3 : vector<1x128xf32> to vector<128x128xf32>
    %5 = arith.addf %2, %4 : vector<128x128xf32>
    %c0_5 = arith.constant 0 : index
    %c0_6 = arith.constant 0 : index
    %6 = vector.load %arg6[%c0_5, %c0_6] : memref<128x128xf32, #tpu.memory_space<vmem>>, vector<128x128xf32>
    tpu.vector_store %arg6[%c0_5, %c0_6], %5 {strides = array<i32>} : memref<128x128xf32, #tpu.memory_space<vmem>>, vector<128x128xf32>,
    %c0_7 = arith.constant 0 : index
    %c0_8 = arith.constant 0 : index
    %7 = vector.load %arg3[%c0_7, %c0_8] : memref<32x128xf32, #tpu.memory_space<vmem>>, vector<32x128xf32>
    %cst_9 = arith.constant 0.000000e+00 : f32
    %8 = vector.broadcast %cst_9 : f32 to vector<8x32xf32>
    %c0_i32 = arith.constant 0 : i32
    %cst_10 = arith.constant dense<0.000000e+00> : vector<8x128xf32>
    %9 = tpu.matmul %8, %7, %cst_10 {dimension_numbers = #tpu.dot_dimension_numbers<[1], [0], [0], [1], [0, 0, 1, 1], [], []>} : vector<8x32xf32>, vector<32x128xf32>, vector<8x128xf32> -> vector<8x128xf32>
    %c8_i32 = arith.constant 8 : i32
    %10 = arith.muli %c0_i32, %c8_i32 : i32
    %11 = arith.index_cast %10 : i32 to index
    %c0_11 = arith.constant 0 : index
    %12 = vector.load %arg6[%11, %c0_11] : memref<128x128xf32, #tpu.memory_space<vmem>>, vector<8x128xf32>
    %13 = arith.addf %12, %9 : vector<8x128xf32>
    %14 = vector.extract_strided_slice %13 {offsets = [0, 0], sizes = [8, 96], strides = [1, 1]} : vector<8x128xf32> to vector<8x96xf32>
    %15 = arith.negf %14 : vector<8x96xf32>
    %16 = math.exp %15 : vector<8x96xf32>
    %cst_12 = arith.constant 1.000000e+00 : f32
    %17 = vector.broadcast %cst_12 : f32 to vector<8x96xf32>
    %18 = arith.addf %17, %16 : vector<8x96xf32>
    %19 = arith.divf %17, %18 : vector<8x96xf32>
    %20 = vector.extract_strided_slice %13 {offsets = [0, 96], sizes = [8, 32], strides = [1, 1]} : vector<8x128xf32> to vector<8x32xf32>
    %21 = math.tanh %20 : vector<8x32xf32>
    %22 = vector.extract_strided_slice %19 {offsets = [0, 32], sizes = [8, 32], strides = [1, 1]} : vector<8x96xf32> to vector<8x32xf32>
    %23 = arith.mulf %22, %8 : vector<8x32xf32>
    %24 = vector.extract_strided_slice %19 {offsets = [0, 0], sizes = [8, 32], strides = [1, 1]} : vector<8x96xf32> to vector<8x32xf32>
    %25 = arith.mulf %24, %21 : vector<8x32xf32>
    %26 = arith.addf %23, %25 : vector<8x32xf32>
    %27 = vector.extract_strided_slice %19 {offsets = [0, 64], sizes = [8, 32], strides = [1, 1]} : vector<8x96xf32> to vector<8x32xf32>
    %28 = math.tanh %26 : vector<8x32xf32>
    %29 = arith.mulf %27, %28 : vector<8x32xf32>
    %30 = vector.extract_strided_slice %29 {offsets = [0, 0], sizes = [8, 16], strides = [1, 1]} : vector<8x32xf32> to vector<8x16xf32>
    %31 = arith.index_cast %10 : i32 to index
    %c0_13 = arith.constant 0 : index
    %32 = vector.load %arg5[%31, %c0_13] : memref<128x32xf32, #tpu.memory_space<vmem>>, vector<8x16xf32>
    tpu.vector_store %arg5[%31, %c0_13], %30 {strides = array<i32>} : memref<128x32xf32, #tpu.memory_space<vmem>>, vector<8x16xf32>,
    %33 = vector.extract_strided_slice %29 {offsets = [0, 16], sizes = [8, 16], strides = [1, 1]} : vector<8x32xf32> to vector<8x16xf32>
    %c15_i32 = arith.constant 15 : i32
    %34 = arith.subi %c15_i32, %c0_i32 : i32
    %c8_i32_14 = arith.constant 8 : i32
    %35 = arith.muli %34, %c8_i32_14 : i32
    %36 = arith.index_cast %35 : i32 to index
    %c16 = arith.constant 16 : index
    %37 = vector.load %arg5[%36, %c16] : memref<128x32xf32, #tpu.memory_space<vmem>>, vector<8x16xf32>
    tpu.vector_store %arg5[%36, %c16], %33 {strides = array<i32>} : memref<128x32xf32, #tpu.memory_space<vmem>>, vector<8x16xf32>,
    %c1_i32 = arith.constant 1 : i32
    %cst_15 = arith.constant dense<0.000000e+00> : vector<8x128xf32>
    %38 = tpu.matmul %29, %7, %cst_15 {dimension_numbers = #tpu.dot_dimension_numbers<[1], [0], [0], [1], [0, 0, 1, 1], [], []>} : vector<8x32xf32>, vector<32x128xf32>, vector<8x128xf32> -> vector<8x128xf32>
    %c8_i32_16 = arith.constant 8 : i32
    %39 = arith.muli %c1_i32, %c8_i32_16 : i32
    %40 = arith.index_cast %39 : i32 to index
    %c0_17 = arith.constant 0 : index
    %41 = vector.load %arg6[%40, %c0_17] : memref<128x128xf32, #tpu.memory_space<vmem>>, vector<8x128xf32>
    %42 = arith.addf %41, %38 : vector<8x128xf32>
    %43 = vector.extract_strided_slice %42 {offsets = [0, 0], sizes = [8, 96], strides = [1, 1]} : vector<8x128xf32> to vector<8x96xf32>
    %44 = arith.negf %43 : vector<8x96xf32>
    %45 = math.exp %44 : vector<8x96xf32>
    %cst_18 = arith.constant 1.000000e+00 : f32
    %46 = vector.broadcast %cst_18 : f32 to vector<8x96xf32>
    %47 = arith.addf %46, %45 : vector<8x96xf32>
    %48 = arith.divf %46, %47 : vector<8x96xf32>
    %49 = vector.extract_strided_slice %42 {offsets = [0, 96], sizes = [8, 32], strides = [1, 1]} : vector<8x128xf32> to vector<8x32xf32>
    %50 = math.tanh %49 : vector<8x32xf32>
    %51 = vector.extract_strided_slice %48 {offsets = [0, 32], sizes = [8, 32], strides = [1, 1]} : vector<8x96xf32> to vector<8x32xf32>
    %52 = arith.mulf %51, %26 : vector<8x32xf32>
    %53 = vector.extract_strided_slice %48 {offsets = [0, 0], sizes = [8, 32], strides = [1, 1]} : vector<8x96xf32> to vector<8x32xf32>
    %54 = arith.mulf %53, %50 : vector<8x32xf32>
    %55 = arith.addf %52, %54 : vector<8x32xf32>
    %56 = vector.extract_strided_slice %48 {offsets = [0, 64], sizes = [8, 32], strides = [1, 1]} : vector<8x96xf32> to vector<8x32xf32>
    %57 = math.tanh %55 : vector<8x32xf32>
    %58 = arith.mulf %56, %57 : vector<8x32xf32>
    %59 = vector.extract_strided_slice %58 {offsets = [0, 0], sizes = [8, 16], strides = [1, 1]} : vector<8x32xf32> to vector<8x16xf32>
    %60 = arith.index_cast %39 : i32 to index
    %c0_19 = arith.constant 0 : index
    %61 = vector.load %arg5[%60, %c0_19] : memref<128x32xf32, #tpu.memory_space<vmem>>, vector<8x16xf32>
    tpu.vector_store %arg5[%60, %c0_19], %59 {strides = array<i32>} : memref<128x32xf32, #tpu.memory_space<vmem>>, vector<8x16xf32>,
    %62 = vector.extract_strided_slice %58 {offsets = [0, 16], sizes = [8, 16], strides = [1, 1]} : vector<8x32xf32> to vector<8x16xf32>
    %c15_i32_20 = arith.constant 15 : i32
    %63 = arith.subi %c15_i32_20, %c1_i32 : i32
    %c8_i32_21 = arith.constant 8 : i32
    %64 = arith.muli %63, %c8_i32_21 : i32
    %65 = arith.index_cast %64 : i32 to index
    %c16_22 = arith.constant 16 : index
    %66 = vector.load %arg5[%65, %c16_22] : memref<128x32xf32, #tpu.memory_space<vmem>>, vector<8x16xf32>
    tpu.vector_store %arg5[%65, %c16_22], %62 {strides = array<i32>} : memref<128x32xf32, #tpu.memory_space<vmem>>, vector<8x16xf32>,
    %c2_i32 = arith.constant 2 : i32
    %cst_23 = arith.constant dense<0.000000e+00> : vector<8x128xf32>
    %67 = tpu.matmul %58, %7, %cst_23 {dimension_numbers = #tpu.dot_dimension_numbers<[1], [0], [0], [1], [0, 0, 1, 1], [], []>} : vector<8x32xf32>, vector<32x128xf32>, vector<8x128xf32> -> vector<8x128xf32>
    %c8_i32_24 = arith.constant 8 : i32
    %68 = arith.muli %c2_i32, %c8_i32_24 : i32
    %69 = arith.index_cast %68 : i32 to index
    %c0_25 = arith.constant 0 : index
    %70 = vector.load %arg6[%69, %c0_25] : memref<128x128xf32, #tpu.memory_space<vmem>>, vector<8x128xf32>
    %71 = arith.addf %70, %67 : vector<8x128xf32>
    %72 = vector.extract_strided_slice %71 {offsets = [0, 0], sizes = [8, 96], strides = [1, 1]} : vector<8x128xf32> to vector<8x96xf32>
    %73 = arith.negf %72 : vector<8x96xf32>
    %74 = math.exp %73 : vector<8x96xf32>
    %cst_26 = arith.constant 1.000000e+00 : f32
    %75 = vector.broadcast %cst_26 : f32 to vector<8x96xf32>
    %76 = arith.addf %75, %74 : vector<8x96xf32>
    %77 = arith.divf %75, %76 : vector<8x96xf32>
    %78 = vector.extract_strided_slice %71 {offsets = [0, 96], sizes = [8, 32], strides = [1, 1]} : vector<8x128xf32> to vector<8x32xf32>
    %79 = math.tanh %78 : vector<8x32xf32>
    %80 = vector.extract_strided_slice %77 {offsets = [0, 32], sizes = [8, 32], strides = [1, 1]} : vector<8x96xf32> to vector<8x32xf32>
    %81 = arith.mulf %80, %55 : vector<8x32xf32>
    %82 = vector.extract_strided_slice %77 {offsets = [0, 0], sizes = [8, 32], strides = [1, 1]} : vector<8x96xf32> to vector<8x32xf32>
    %83 = arith.mulf %82, %79 : vector<8x32xf32>
    %84 = arith.addf %81, %83 : vector<8x32xf32>
    %85 = vector.extract_strided_slice %77 {offsets = [0, 64], sizes = [8, 32], strides = [1, 1]} : vector<8x96xf32> to vector<8x32xf32>
    %86 = math.tanh %84 : vector<8x32xf32>
    %87 = arith.mulf %85, %86 : vector<8x32xf32>
    %88 = vector.extract_strided_slice %87 {offsets = [0, 0], sizes = [8, 16], strides = [1, 1]} : vector<8x32xf32> to vector<8x16xf32>
    %89 = arith.index_cast %68 : i32 to index
    %c0_27 = arith.constant 0 : index
    %90 = vector.load %arg5[%89, %c0_27] : memref<128x32xf32, #tpu.memory_space<vmem>>, vector<8x16xf32>
    tpu.vector_store %arg5[%89, %c0_27], %88 {strides = array<i32>} : memref<128x32xf32, #tpu.memory_space<vmem>>, vector<8x16xf32>,
    %91 = vector.extract_strided_slice %87 {offsets = [0, 16], sizes = [8, 16], strides = [1, 1]} : vector<8x32xf32> to vector<8x16xf32>
    %c15_i32_28 = arith.constant 15 : i32
    %92 = arith.subi %c15_i32_28, %c2_i32 : i32
    %c8_i32_29 = arith.constant 8 : i32
    %93 = arith.muli %92, %c8_i32_29 : i32
    %94 = arith.index_cast %93 : i32 to index
    %c16_30 = arith.constant 16 : index
    %95 = vector.load %arg5[%94, %c16_30] : memref<128x32xf32, #tpu.memory_space<vmem>>, vector<8x16xf32>
    tpu.vector_store %arg5[%94, %c16_30], %91 {strides = array<i32>} : memref<128x32xf32, #tpu.memory_space<vmem>>, vector<8x16xf32>,
    %c3_i32 = arith.constant 3 : i32
    %cst_31 = arith.constant dense<0.000000e+00> : vector<8x128xf32>
    %96 = tpu.matmul %87, %7, %cst_31 {dimension_numbers = #tpu.dot_dimension_numbers<[1], [0], [0], [1], [0, 0, 1, 1], [], []>} : vector<8x32xf32>, vector<32x128xf32>, vector<8x128xf32> -> vector<8x128xf32>
    %c8_i32_32 = arith.constant 8 : i32
    %97 = arith.muli %c3_i32, %c8_i32_32 : i32
    %98 = arith.index_cast %97 : i32 to index
    %c0_33 = arith.constant 0 : index
    %99 = vector.load %arg6[%98, %c0_33] : memref<128x128xf32, #tpu.memory_space<vmem>>, vector<8x128xf32>
    %100 = arith.addf %99, %96 : vector<8x128xf32>
    %101 = vector.extract_strided_slice %100 {offsets = [0, 0], sizes = [8, 96], strides = [1, 1]} : vector<8x128xf32> to vector<8x96xf32>
    %102 = arith.negf %101 : vector<8x96xf32>
    %103 = math.exp %102 : vector<8x96xf32>
    %cst_34 = arith.constant 1.000000e+00 : f32
    %104 = vector.broadcast %cst_34 : f32 to vector<8x96xf32>
    %105 = arith.addf %104, %103 : vector<8x96xf32>
    %106 = arith.divf %104, %105 : vector<8x96xf32>
    %107 = vector.extract_strided_slice %100 {offsets = [0, 96], sizes = [8, 32], strides = [1, 1]} : vector<8x128xf32> to vector<8x32xf32>
    %108 = math.tanh %107 : vector<8x32xf32>
    %109 = vector.extract_strided_slice %106 {offsets = [0, 32], sizes = [8, 32], strides = [1, 1]} : vector<8x96xf32> to vector<8x32xf32>
    %110 = arith.mulf %109, %84 : vector<8x32xf32>
    %111 = vector.extract_strided_slice %106 {offsets = [0, 0], sizes = [8, 32], strides = [1, 1]} : vector<8x96xf32> to vector<8x32xf32>
    %112 = arith.mulf %111, %108 : vector<8x32xf32>
    %113 = arith.addf %110, %112 : vector<8x32xf32>
    %114 = vector.extract_strided_slice %106 {offsets = [0, 64], sizes = [8, 32], strides = [1, 1]} : vector<8x96xf32> to vector<8x32xf32>
    %115 = math.tanh %113 : vector<8x32xf32>
    %116 = arith.mulf %114, %115 : vector<8x32xf32>
    %117 = vector.extract_strided_slice %116 {offsets = [0, 0], sizes = [8, 16], strides = [1, 1]} : vector<8x32xf32> to vector<8x16xf32>
    %118 = arith.index_cast %97 : i32 to index
    %c0_35 = arith.constant 0 : index
    %119 = vector.load %arg5[%118, %c0_35] : memref<128x32xf32, #tpu.memory_space<vmem>>, vector<8x16xf32>
    tpu.vector_store %arg5[%118, %c0_35], %117 {strides = array<i32>} : memref<128x32xf32, #tpu.memory_space<vmem>>, vector<8x16xf32>,
    %120 = vector.extract_strided_slice %116 {offsets = [0, 16], sizes = [8, 16], strides = [1, 1]} : vector<8x32xf32> to vector<8x16xf32>
    %c15_i32_36 = arith.constant 15 : i32
    %121 = arith.subi %c15_i32_36, %c3_i32 : i32
    %c8_i32_37 = arith.constant 8 : i32
    %122 = arith.muli %121, %c8_i32_37 : i32
    %123 = arith.index_cast %122 : i32 to index
    %c16_38 = arith.constant 16 : index
    %124 = vector.load %arg5[%123, %c16_38] : memref<128x32xf32, #tpu.memory_space<vmem>>, vector<8x16xf32>
    tpu.vector_store %arg5[%123, %c16_38], %120 {strides = array<i32>} : memref<128x32xf32, #tpu.memory_space<vmem>>, vector<8x16xf32>,
    %c4_i32 = arith.constant 4 : i32
    %cst_39 = arith.constant dense<0.000000e+00> : vector<8x128xf32>
    %125 = tpu.matmul %116, %7, %cst_39 {dimension_numbers = #tpu.dot_dimension_numbers<[1], [0], [0], [1], [0, 0, 1, 1], [], []>} : vector<8x32xf32>, vector<32x128xf32>, vector<8x128xf32> -> vector<8x128xf32>
    %c8_i32_40 = arith.constant 8 : i32
    %126 = arith.muli %c4_i32, %c8_i32_40 : i32
    %127 = arith.index_cast %126 : i32 to index
    %c0_41 = arith.constant 0 : index
    %128 = vector.load %arg6[%127, %c0_41] : memref<128x128xf32, #tpu.memory_space<vmem>>, vector<8x128xf32>
    %129 = arith.addf %128, %125 : vector<8x128xf32>
    %130 = vector.extract_strided_slice %129 {offsets = [0, 0], sizes = [8, 96], strides = [1, 1]} : vector<8x128xf32> to vector<8x96xf32>
    %131 = arith.negf %130 : vector<8x96xf32>
    %132 = math.exp %131 : vector<8x96xf32>
    %cst_42 = arith.constant 1.000000e+00 : f32
    %133 = vector.broadcast %cst_42 : f32 to vector<8x96xf32>
    %134 = arith.addf %133, %132 : vector<8x96xf32>
    %135 = arith.divf %133, %134 : vector<8x96xf32>
    %136 = vector.extract_strided_slice %129 {offsets = [0, 96], sizes = [8, 32], strides = [1, 1]} : vector<8x128xf32> to vector<8x32xf32>
    %137 = math.tanh %136 : vector<8x32xf32>
    %138 = vector.extract_strided_slice %135 {offsets = [0, 32], sizes = [8, 32], strides = [1, 1]} : vector<8x96xf32> to vector<8x32xf32>
    %139 = arith.mulf %138, %113 : vector<8x32xf32>
    %140 = vector.extract_strided_slice %135 {offsets = [0, 0], sizes = [8, 32], strides = [1, 1]} : vector<8x96xf32> to vector<8x32xf32>
    %141 = arith.mulf %140, %137 : vector<8x32xf32>
    %142 = arith.addf %139, %141 : vector<8x32xf32>
    %143 = vector.extract_strided_slice %135 {offsets = [0, 64], sizes = [8, 32], strides = [1, 1]} : vector<8x96xf32> to vector<8x32xf32>
    %144 = math.tanh %142 : vector<8x32xf32>
    %145 = arith.mulf %143, %144 : vector<8x32xf32>
    %146 = vector.extract_strided_slice %145 {offsets = [0, 0], sizes = [8, 16], strides = [1, 1]} : vector<8x32xf32> to vector<8x16xf32>
    %147 = arith.index_cast %126 : i32 to index
    %c0_43 = arith.constant 0 : index
    %148 = vector.load %arg5[%147, %c0_43] : memref<128x32xf32, #tpu.memory_space<vmem>>, vector<8x16xf32>
    tpu.vector_store %arg5[%147, %c0_43], %146 {strides = array<i32>} : memref<128x32xf32, #tpu.memory_space<vmem>>, vector<8x16xf32>,
    %149 = vector.extract_strided_slice %145 {offsets = [0, 16], sizes = [8, 16], strides = [1, 1]} : vector<8x32xf32> to vector<8x16xf32>
    %c15_i32_44 = arith.constant 15 : i32
    %150 = arith.subi %c15_i32_44, %c4_i32 : i32
    %c8_i32_45 = arith.constant 8 : i32
    %151 = arith.muli %150, %c8_i32_45 : i32
    %152 = arith.index_cast %151 : i32 to index
    %c16_46 = arith.constant 16 : index
    %153 = vector.load %arg5[%152, %c16_46] : memref<128x32xf32, #tpu.memory_space<vmem>>, vector<8x16xf32>
    tpu.vector_store %arg5[%152, %c16_46], %149 {strides = array<i32>} : memref<128x32xf32, #tpu.memory_space<vmem>>, vector<8x16xf32>,
    %c5_i32 = arith.constant 5 : i32
    %cst_47 = arith.constant dense<0.000000e+00> : vector<8x128xf32>
    %154 = tpu.matmul %145, %7, %cst_47 {dimension_numbers = #tpu.dot_dimension_numbers<[1], [0], [0], [1], [0, 0, 1, 1], [], []>} : vector<8x32xf32>, vector<32x128xf32>, vector<8x128xf32> -> vector<8x128xf32>
    %c8_i32_48 = arith.constant 8 : i32
    %155 = arith.muli %c5_i32, %c8_i32_48 : i32
    %156 = arith.index_cast %155 : i32 to index
    %c0_49 = arith.constant 0 : index
    %157 = vector.load %arg6[%156, %c0_49] : memref<128x128xf32, #tpu.memory_space<vmem>>, vector<8x128xf32>
    %158 = arith.addf %157, %154 : vector<8x128xf32>
    %159 = vector.extract_strided_slice %158 {offsets = [0, 0], sizes = [8, 96], strides = [1, 1]} : vector<8x128xf32> to vector<8x96xf32>
    %160 = arith.negf %159 : vector<8x96xf32>
    %161 = math.exp %160 : vector<8x96xf32>
    %cst_50 = arith.constant 1.000000e+00 : f32
    %162 = vector.broadcast %cst_50 : f32 to vector<8x96xf32>
    %163 = arith.addf %162, %161 : vector<8x96xf32>
    %164 = arith.divf %162, %163 : vector<8x96xf32>
    %165 = vector.extract_strided_slice %158 {offsets = [0, 96], sizes = [8, 32], strides = [1, 1]} : vector<8x128xf32> to vector<8x32xf32>
    %166 = math.tanh %165 : vector<8x32xf32>
    %167 = vector.extract_strided_slice %164 {offsets = [0, 32], sizes = [8, 32], strides = [1, 1]} : vector<8x96xf32> to vector<8x32xf32>
    %168 = arith.mulf %167, %142 : vector<8x32xf32>
    %169 = vector.extract_strided_slice %164 {offsets = [0, 0], sizes = [8, 32], strides = [1, 1]} : vector<8x96xf32> to vector<8x32xf32>
    %170 = arith.mulf %169, %166 : vector<8x32xf32>
    %171 = arith.addf %168, %170 : vector<8x32xf32>
    %172 = vector.extract_strided_slice %164 {offsets = [0, 64], sizes = [8, 32], strides = [1, 1]} : vector<8x96xf32> to vector<8x32xf32>
    %173 = math.tanh %171 : vector<8x32xf32>
    %174 = arith.mulf %172, %173 : vector<8x32xf32>
    %175 = vector.extract_strided_slice %174 {offsets = [0, 0], sizes = [8, 16], strides = [1, 1]} : vector<8x32xf32> to vector<8x16xf32>
    %176 = arith.index_cast %155 : i32 to index
    %c0_51 = arith.constant 0 : index
    %177 = vector.load %arg5[%176, %c0_51] : memref<128x32xf32, #tpu.memory_space<vmem>>, vector<8x16xf32>
    tpu.vector_store %arg5[%176, %c0_51], %175 {strides = array<i32>} : memref<128x32xf32, #tpu.memory_space<vmem>>, vector<8x16xf32>,
    %178 = vector.extract_strided_slice %174 {offsets = [0, 16], sizes = [8, 16], strides = [1, 1]} : vector<8x32xf32> to vector<8x16xf32>
    %c15_i32_52 = arith.constant 15 : i32
    %179 = arith.subi %c15_i32_52, %c5_i32 : i32
    %c8_i32_53 = arith.constant 8 : i32
    %180 = arith.muli %179, %c8_i32_53 : i32
    %181 = arith.index_cast %180 : i32 to index
    %c16_54 = arith.constant 16 : index
    %182 = vector.load %arg5[%181, %c16_54] : memref<128x32xf32, #tpu.memory_space<vmem>>, vector<8x16xf32>
    tpu.vector_store %arg5[%181, %c16_54], %178 {strides = array<i32>} : memref<128x32xf32, #tpu.memory_space<vmem>>, vector<8x16xf32>,
    %c6_i32 = arith.constant 6 : i32
    %cst_55 = arith.constant dense<0.000000e+00> : vector<8x128xf32>
    %183 = tpu.matmul %174, %7, %cst_55 {dimension_numbers = #tpu.dot_dimension_numbers<[1], [0], [0], [1], [0, 0, 1, 1], [], []>} : vector<8x32xf32>, vector<32x128xf32>, vector<8x128xf32> -> vector<8x128xf32>
    %c8_i32_56 = arith.constant 8 : i32
    %184 = arith.muli %c6_i32, %c8_i32_56 : i32
    %185 = arith.index_cast %184 : i32 to index
    %c0_57 = arith.constant 0 : index
    %186 = vector.load %arg6[%185, %c0_57] : memref<128x128xf32, #tpu.memory_space<vmem>>, vector<8x128xf32>
    %187 = arith.addf %186, %183 : vector<8x128xf32>
    %188 = vector.extract_strided_slice %187 {offsets = [0, 0], sizes = [8, 96], strides = [1, 1]} : vector<8x128xf32> to vector<8x96xf32>
    %189 = arith.negf %188 : vector<8x96xf32>
    %190 = math.exp %189 : vector<8x96xf32>
    %cst_58 = arith.constant 1.000000e+00 : f32
    %191 = vector.broadcast %cst_58 : f32 to vector<8x96xf32>
    %192 = arith.addf %191, %190 : vector<8x96xf32>
    %193 = arith.divf %191, %192 : vector<8x96xf32>
    %194 = vector.extract_strided_slice %187 {offsets = [0, 96], sizes = [8, 32], strides = [1, 1]} : vector<8x128xf32> to vector<8x32xf32>
    %195 = math.tanh %194 : vector<8x32xf32>
    %196 = vector.extract_strided_slice %193 {offsets = [0, 32], sizes = [8, 32], strides = [1, 1]} : vector<8x96xf32> to vector<8x32xf32>
    %197 = arith.mulf %196, %171 : vector<8x32xf32>
    %198 = vector.extract_strided_slice %193 {offsets = [0, 0], sizes = [8, 32], strides = [1, 1]} : vector<8x96xf32> to vector<8x32xf32>
    %199 = arith.mulf %198, %195 : vector<8x32xf32>
    %200 = arith.addf %197, %199 : vector<8x32xf32>
    %201 = vector.extract_strided_slice %193 {offsets = [0, 64], sizes = [8, 32], strides = [1, 1]} : vector<8x96xf32> to vector<8x32xf32>
    %202 = math.tanh %200 : vector<8x32xf32>
    %203 = arith.mulf %201, %202 : vector<8x32xf32>
    %204 = vector.extract_strided_slice %203 {offsets = [0, 0], sizes = [8, 16], strides = [1, 1]} : vector<8x32xf32> to vector<8x16xf32>
    %205 = arith.index_cast %184 : i32 to index
    %c0_59 = arith.constant 0 : index
    %206 = vector.load %arg5[%205, %c0_59] : memref<128x32xf32, #tpu.memory_space<vmem>>, vector<8x16xf32>
    tpu.vector_store %arg5[%205, %c0_59], %204 {strides = array<i32>} : memref<128x32xf32, #tpu.memory_space<vmem>>, vector<8x16xf32>,
    %207 = vector.extract_strided_slice %203 {offsets = [0, 16], sizes = [8, 16], strides = [1, 1]} : vector<8x32xf32> to vector<8x16xf32>
    %c15_i32_60 = arith.constant 15 : i32
    %208 = arith.subi %c15_i32_60, %c6_i32 : i32
    %c8_i32_61 = arith.constant 8 : i32
    %209 = arith.muli %208, %c8_i32_61 : i32
    %210 = arith.index_cast %209 : i32 to index
    %c16_62 = arith.constant 16 : index
    %211 = vector.load %arg5[%210, %c16_62] : memref<128x32xf32, #tpu.memory_space<vmem>>, vector<8x16xf32>
    tpu.vector_store %arg5[%210, %c16_62], %207 {strides = array<i32>} : memref<128x32xf32, #tpu.memory_space<vmem>>, vector<8x16xf32>,
    %c7_i32 = arith.constant 7 : i32
    %cst_63 = arith.constant dense<0.000000e+00> : vector<8x128xf32>
    %212 = tpu.matmul %203, %7, %cst_63 {dimension_numbers = #tpu.dot_dimension_numbers<[1], [0], [0], [1], [0, 0, 1, 1], [], []>} : vector<8x32xf32>, vector<32x128xf32>, vector<8x128xf32> -> vector<8x128xf32>
    %c8_i32_64 = arith.constant 8 : i32
    %213 = arith.muli %c7_i32, %c8_i32_64 : i32
    %214 = arith.index_cast %213 : i32 to index
    %c0_65 = arith.constant 0 : index
    %215 = vector.load %arg6[%214, %c0_65] : memref<128x128xf32, #tpu.memory_space<vmem>>, vector<8x128xf32>
    %216 = arith.addf %215, %212 : vector<8x128xf32>
    %217 = vector.extract_strided_slice %216 {offsets = [0, 0], sizes = [8, 96], strides = [1, 1]} : vector<8x128xf32> to vector<8x96xf32>
    %218 = arith.negf %217 : vector<8x96xf32>
    %219 = math.exp %218 : vector<8x96xf32>
    %cst_66 = arith.constant 1.000000e+00 : f32
    %220 = vector.broadcast %cst_66 : f32 to vector<8x96xf32>
    %221 = arith.addf %220, %219 : vector<8x96xf32>
    %222 = arith.divf %220, %221 : vector<8x96xf32>
    %223 = vector.extract_strided_slice %216 {offsets = [0, 96], sizes = [8, 32], strides = [1, 1]} : vector<8x128xf32> to vector<8x32xf32>
    %224 = math.tanh %223 : vector<8x32xf32>
    %225 = vector.extract_strided_slice %222 {offsets = [0, 32], sizes = [8, 32], strides = [1, 1]} : vector<8x96xf32> to vector<8x32xf32>
    %226 = arith.mulf %225, %200 : vector<8x32xf32>
    %227 = vector.extract_strided_slice %222 {offsets = [0, 0], sizes = [8, 32], strides = [1, 1]} : vector<8x96xf32> to vector<8x32xf32>
    %228 = arith.mulf %227, %224 : vector<8x32xf32>
    %229 = arith.addf %226, %228 : vector<8x32xf32>
    %230 = vector.extract_strided_slice %222 {offsets = [0, 64], sizes = [8, 32], strides = [1, 1]} : vector<8x96xf32> to vector<8x32xf32>
    %231 = math.tanh %229 : vector<8x32xf32>
    %232 = arith.mulf %230, %231 : vector<8x32xf32>
    %233 = vector.extract_strided_slice %232 {offsets = [0, 0], sizes = [8, 16], strides = [1, 1]} : vector<8x32xf32> to vector<8x16xf32>
    %234 = arith.index_cast %213 : i32 to index
    %c0_67 = arith.constant 0 : index
    %235 = vector.load %arg5[%234, %c0_67] : memref<128x32xf32, #tpu.memory_space<vmem>>, vector<8x16xf32>
    tpu.vector_store %arg5[%234, %c0_67], %233 {strides = array<i32>} : memref<128x32xf32, #tpu.memory_space<vmem>>, vector<8x16xf32>,
    %236 = vector.extract_strided_slice %232 {offsets = [0, 16], sizes = [8, 16], strides = [1, 1]} : vector<8x32xf32> to vector<8x16xf32>
    %c15_i32_68 = arith.constant 15 : i32
    %237 = arith.subi %c15_i32_68, %c7_i32 : i32
    %c8_i32_69 = arith.constant 8 : i32
    %238 = arith.muli %237, %c8_i32_69 : i32
    %239 = arith.index_cast %238 : i32 to index
    %c16_70 = arith.constant 16 : index
    %240 = vector.load %arg5[%239, %c16_70] : memref<128x32xf32, #tpu.memory_space<vmem>>, vector<8x16xf32>
    tpu.vector_store %arg5[%239, %c16_70], %236 {strides = array<i32>} : memref<128x32xf32, #tpu.memory_space<vmem>>, vector<8x16xf32>,
    %c8_i32_71 = arith.constant 8 : i32
    %cst_72 = arith.constant dense<0.000000e+00> : vector<8x128xf32>
    %241 = tpu.matmul %232, %7, %cst_72 {dimension_numbers = #tpu.dot_dimension_numbers<[1], [0], [0], [1], [0, 0, 1, 1], [], []>} : vector<8x32xf32>, vector<32x128xf32>, vector<8x128xf32> -> vector<8x128xf32>
    %c8_i32_73 = arith.constant 8 : i32
    %242 = arith.muli %c8_i32_71, %c8_i32_73 : i32
    %243 = arith.index_cast %242 : i32 to index
    %c0_74 = arith.constant 0 : index
    %244 = vector.load %arg6[%243, %c0_74] : memref<128x128xf32, #tpu.memory_space<vmem>>, vector<8x128xf32>
    %245 = arith.addf %244, %241 : vector<8x128xf32>
    %246 = vector.extract_strided_slice %245 {offsets = [0, 0], sizes = [8, 96], strides = [1, 1]} : vector<8x128xf32> to vector<8x96xf32>
    %247 = arith.negf %246 : vector<8x96xf32>
    %248 = math.exp %247 : vector<8x96xf32>
    %cst_75 = arith.constant 1.000000e+00 : f32
    %249 = vector.broadcast %cst_75 : f32 to vector<8x96xf32>
    %250 = arith.addf %249, %248 : vector<8x96xf32>
    %251 = arith.divf %249, %250 : vector<8x96xf32>
    %252 = vector.extract_strided_slice %245 {offsets = [0, 96], sizes = [8, 32], strides = [1, 1]} : vector<8x128xf32> to vector<8x32xf32>
    %253 = math.tanh %252 : vector<8x32xf32>
    %254 = vector.extract_strided_slice %251 {offsets = [0, 32], sizes = [8, 32], strides = [1, 1]} : vector<8x96xf32> to vector<8x32xf32>
    %255 = arith.mulf %254, %229 : vector<8x32xf32>
    %256 = vector.extract_strided_slice %251 {offsets = [0, 0], sizes = [8, 32], strides = [1, 1]} : vector<8x96xf32> to vector<8x32xf32>
    %257 = arith.mulf %256, %253 : vector<8x32xf32>
    %258 = arith.addf %255, %257 : vector<8x32xf32>
    %259 = vector.extract_strided_slice %251 {offsets = [0, 64], sizes = [8, 32], strides = [1, 1]} : vector<8x96xf32> to vector<8x32xf32>
    %260 = math.tanh %258 : vector<8x32xf32>
    %261 = arith.mulf %259, %260 : vector<8x32xf32>
    %262 = vector.extract_strided_slice %261 {offsets = [0, 0], sizes = [8, 16], strides = [1, 1]} : vector<8x32xf32> to vector<8x16xf32>
    %263 = arith.index_cast %242 : i32 to index
    %c0_76 = arith.constant 0 : index
    %264 = vector.load %arg5[%263, %c0_76] : memref<128x32xf32, #tpu.memory_space<vmem>>, vector<8x16xf32>
    tpu.vector_store %arg5[%263, %c0_76], %262 {strides = array<i32>} : memref<128x32xf32, #tpu.memory_space<vmem>>, vector<8x16xf32>,
    %265 = vector.extract_strided_slice %261 {offsets = [0, 16], sizes = [8, 16], strides = [1, 1]} : vector<8x32xf32> to vector<8x16xf32>
    %c15_i32_77 = arith.constant 15 : i32
    %266 = arith.subi %c15_i32_77, %c8_i32_71 : i32
    %c8_i32_78 = arith.constant 8 : i32
    %267 = arith.muli %266, %c8_i32_78 : i32
    %268 = arith.index_cast %267 : i32 to index
    %c16_79 = arith.constant 16 : index
    %269 = vector.load %arg5[%268, %c16_79] : memref<128x32xf32, #tpu.memory_space<vmem>>, vector<8x16xf32>
    tpu.vector_store %arg5[%268, %c16_79], %265 {strides = array<i32>} : memref<128x32xf32, #tpu.memory_space<vmem>>, vector<8x16xf32>,
    %c9_i32 = arith.constant 9 : i32
    %cst_80 = arith.constant dense<0.000000e+00> : vector<8x128xf32>
    %270 = tpu.matmul %261, %7, %cst_80 {dimension_numbers = #tpu.dot_dimension_numbers<[1], [0], [0], [1], [0, 0, 1, 1], [], []>} : vector<8x32xf32>, vector<32x128xf32>, vector<8x128xf32> -> vector<8x128xf32>
    %c8_i32_81 = arith.constant 8 : i32
    %271 = arith.muli %c9_i32, %c8_i32_81 : i32
    %272 = arith.index_cast %271 : i32 to index
    %c0_82 = arith.constant 0 : index
    %273 = vector.load %arg6[%272, %c0_82] : memref<128x128xf32, #tpu.memory_space<vmem>>, vector<8x128xf32>
    %274 = arith.addf %273, %270 : vector<8x128xf32>
    %275 = vector.extract_strided_slice %274 {offsets = [0, 0], sizes = [8, 96], strides = [1, 1]} : vector<8x128xf32> to vector<8x96xf32>
    %276 = arith.negf %275 : vector<8x96xf32>
    %277 = math.exp %276 : vector<8x96xf32>
    %cst_83 = arith.constant 1.000000e+00 : f32
    %278 = vector.broadcast %cst_83 : f32 to vector<8x96xf32>
    %279 = arith.addf %278, %277 : vector<8x96xf32>
    %280 = arith.divf %278, %279 : vector<8x96xf32>
    %281 = vector.extract_strided_slice %274 {offsets = [0, 96], sizes = [8, 32], strides = [1, 1]} : vector<8x128xf32> to vector<8x32xf32>
    %282 = math.tanh %281 : vector<8x32xf32>
    %283 = vector.extract_strided_slice %280 {offsets = [0, 32], sizes = [8, 32], strides = [1, 1]} : vector<8x96xf32> to vector<8x32xf32>
    %284 = arith.mulf %283, %258 : vector<8x32xf32>
    %285 = vector.extract_strided_slice %280 {offsets = [0, 0], sizes = [8, 32], strides = [1, 1]} : vector<8x96xf32> to vector<8x32xf32>
    %286 = arith.mulf %285, %282 : vector<8x32xf32>
    %287 = arith.addf %284, %286 : vector<8x32xf32>
    %288 = vector.extract_strided_slice %280 {offsets = [0, 64], sizes = [8, 32], strides = [1, 1]} : vector<8x96xf32> to vector<8x32xf32>
    %289 = math.tanh %287 : vector<8x32xf32>
    %290 = arith.mulf %288, %289 : vector<8x32xf32>
    %291 = vector.extract_strided_slice %290 {offsets = [0, 0], sizes = [8, 16], strides = [1, 1]} : vector<8x32xf32> to vector<8x16xf32>
    %292 = arith.index_cast %271 : i32 to index
    %c0_84 = arith.constant 0 : index
    %293 = vector.load %arg5[%292, %c0_84] : memref<128x32xf32, #tpu.memory_space<vmem>>, vector<8x16xf32>
    tpu.vector_store %arg5[%292, %c0_84], %291 {strides = array<i32>} : memref<128x32xf32, #tpu.memory_space<vmem>>, vector<8x16xf32>,
    %294 = vector.extract_strided_slice %290 {offsets = [0, 16], sizes = [8, 16], strides = [1, 1]} : vector<8x32xf32> to vector<8x16xf32>
    %c15_i32_85 = arith.constant 15 : i32
    %295 = arith.subi %c15_i32_85, %c9_i32 : i32
    %c8_i32_86 = arith.constant 8 : i32
    %296 = arith.muli %295, %c8_i32_86 : i32
    %297 = arith.index_cast %296 : i32 to index
    %c16_87 = arith.constant 16 : index
    %298 = vector.load %arg5[%297, %c16_87] : memref<128x32xf32, #tpu.memory_space<vmem>>, vector<8x16xf32>
    tpu.vector_store %arg5[%297, %c16_87], %294 {strides = array<i32>} : memref<128x32xf32, #tpu.memory_space<vmem>>, vector<8x16xf32>,
    %c10_i32 = arith.constant 10 : i32
    %cst_88 = arith.constant dense<0.000000e+00> : vector<8x128xf32>
    %299 = tpu.matmul %290, %7, %cst_88 {dimension_numbers = #tpu.dot_dimension_numbers<[1], [0], [0], [1], [0, 0, 1, 1], [], []>} : vector<8x32xf32>, vector<32x128xf32>, vector<8x128xf32> -> vector<8x128xf32>
    %c8_i32_89 = arith.constant 8 : i32
    %300 = arith.muli %c10_i32, %c8_i32_89 : i32
    %301 = arith.index_cast %300 : i32 to index
    %c0_90 = arith.constant 0 : index
    %302 = vector.load %arg6[%301, %c0_90] : memref<128x128xf32, #tpu.memory_space<vmem>>, vector<8x128xf32>
    %303 = arith.addf %302, %299 : vector<8x128xf32>
    %304 = vector.extract_strided_slice %303 {offsets = [0, 0], sizes = [8, 96], strides = [1, 1]} : vector<8x128xf32> to vector<8x96xf32>
    %305 = arith.negf %304 : vector<8x96xf32>
    %306 = math.exp %305 : vector<8x96xf32>
    %cst_91 = arith.constant 1.000000e+00 : f32
    %307 = vector.broadcast %cst_91 : f32 to vector<8x96xf32>
    %308 = arith.addf %307, %306 : vector<8x96xf32>
    %309 = arith.divf %307, %308 : vector<8x96xf32>
    %310 = vector.extract_strided_slice %303 {offsets = [0, 96], sizes = [8, 32], strides = [1, 1]} : vector<8x128xf32> to vector<8x32xf32>
    %311 = math.tanh %310 : vector<8x32xf32>
    %312 = vector.extract_strided_slice %309 {offsets = [0, 32], sizes = [8, 32], strides = [1, 1]} : vector<8x96xf32> to vector<8x32xf32>
    %313 = arith.mulf %312, %287 : vector<8x32xf32>
    %314 = vector.extract_strided_slice %309 {offsets = [0, 0], sizes = [8, 32], strides = [1, 1]} : vector<8x96xf32> to vector<8x32xf32>
    %315 = arith.mulf %314, %311 : vector<8x32xf32>
    %316 = arith.addf %313, %315 : vector<8x32xf32>
    %317 = vector.extract_strided_slice %309 {offsets = [0, 64], sizes = [8, 32], strides = [1, 1]} : vector<8x96xf32> to vector<8x32xf32>
    %318 = math.tanh %316 : vector<8x32xf32>
    %319 = arith.mulf %317, %318 : vector<8x32xf32>
    %320 = vector.extract_strided_slice %319 {offsets = [0, 0], sizes = [8, 16], strides = [1, 1]} : vector<8x32xf32> to vector<8x16xf32>
    %321 = arith.index_cast %300 : i32 to index
    %c0_92 = arith.constant 0 : index
    %322 = vector.load %arg5[%321, %c0_92] : memref<128x32xf32, #tpu.memory_space<vmem>>, vector<8x16xf32>
    tpu.vector_store %arg5[%321, %c0_92], %320 {strides = array<i32>} : memref<128x32xf32, #tpu.memory_space<vmem>>, vector<8x16xf32>,
    %323 = vector.extract_strided_slice %319 {offsets = [0, 16], sizes = [8, 16], strides = [1, 1]} : vector<8x32xf32> to vector<8x16xf32>
    %c15_i32_93 = arith.constant 15 : i32
    %324 = arith.subi %c15_i32_93, %c10_i32 : i32
    %c8_i32_94 = arith.constant 8 : i32
    %325 = arith.muli %324, %c8_i32_94 : i32
    %326 = arith.index_cast %325 : i32 to index
    %c16_95 = arith.constant 16 : index
    %327 = vector.load %arg5[%326, %c16_95] : memref<128x32xf32, #tpu.memory_space<vmem>>, vector<8x16xf32>
    tpu.vector_store %arg5[%326, %c16_95], %323 {strides = array<i32>} : memref<128x32xf32, #tpu.memory_space<vmem>>, vector<8x16xf32>,
    %c11_i32 = arith.constant 11 : i32
    %cst_96 = arith.constant dense<0.000000e+00> : vector<8x128xf32>
    %328 = tpu.matmul %319, %7, %cst_96 {dimension_numbers = #tpu.dot_dimension_numbers<[1], [0], [0], [1], [0, 0, 1, 1], [], []>} : vector<8x32xf32>, vector<32x128xf32>, vector<8x128xf32> -> vector<8x128xf32>
    %c8_i32_97 = arith.constant 8 : i32
    %329 = arith.muli %c11_i32, %c8_i32_97 : i32
    %330 = arith.index_cast %329 : i32 to index
    %c0_98 = arith.constant 0 : index
    %331 = vector.load %arg6[%330, %c0_98] : memref<128x128xf32, #tpu.memory_space<vmem>>, vector<8x128xf32>
    %332 = arith.addf %331, %328 : vector<8x128xf32>
    %333 = vector.extract_strided_slice %332 {offsets = [0, 0], sizes = [8, 96], strides = [1, 1]} : vector<8x128xf32> to vector<8x96xf32>
    %334 = arith.negf %333 : vector<8x96xf32>
    %335 = math.exp %334 : vector<8x96xf32>
    %cst_99 = arith.constant 1.000000e+00 : f32
    %336 = vector.broadcast %cst_99 : f32 to vector<8x96xf32>
    %337 = arith.addf %336, %335 : vector<8x96xf32>
    %338 = arith.divf %336, %337 : vector<8x96xf32>
    %339 = vector.extract_strided_slice %332 {offsets = [0, 96], sizes = [8, 32], strides = [1, 1]} : vector<8x128xf32> to vector<8x32xf32>
    %340 = math.tanh %339 : vector<8x32xf32>
    %341 = vector.extract_strided_slice %338 {offsets = [0, 32], sizes = [8, 32], strides = [1, 1]} : vector<8x96xf32> to vector<8x32xf32>
    %342 = arith.mulf %341, %316 : vector<8x32xf32>
    %343 = vector.extract_strided_slice %338 {offsets = [0, 0], sizes = [8, 32], strides = [1, 1]} : vector<8x96xf32> to vector<8x32xf32>
    %344 = arith.mulf %343, %340 : vector<8x32xf32>
    %345 = arith.addf %342, %344 : vector<8x32xf32>
    %346 = vector.extract_strided_slice %338 {offsets = [0, 64], sizes = [8, 32], strides = [1, 1]} : vector<8x96xf32> to vector<8x32xf32>
    %347 = math.tanh %345 : vector<8x32xf32>
    %348 = arith.mulf %346, %347 : vector<8x32xf32>
    %349 = vector.extract_strided_slice %348 {offsets = [0, 0], sizes = [8, 16], strides = [1, 1]} : vector<8x32xf32> to vector<8x16xf32>
    %350 = arith.index_cast %329 : i32 to index
    %c0_100 = arith.constant 0 : index
    %351 = vector.load %arg5[%350, %c0_100] : memref<128x32xf32, #tpu.memory_space<vmem>>, vector<8x16xf32>
    tpu.vector_store %arg5[%350, %c0_100], %349 {strides = array<i32>} : memref<128x32xf32, #tpu.memory_space<vmem>>, vector<8x16xf32>,
    %352 = vector.extract_strided_slice %348 {offsets = [0, 16], sizes = [8, 16], strides = [1, 1]} : vector<8x32xf32> to vector<8x16xf32>
    %c15_i32_101 = arith.constant 15 : i32
    %353 = arith.subi %c15_i32_101, %c11_i32 : i32
    %c8_i32_102 = arith.constant 8 : i32
    %354 = arith.muli %353, %c8_i32_102 : i32
    %355 = arith.index_cast %354 : i32 to index
    %c16_103 = arith.constant 16 : index
    %356 = vector.load %arg5[%355, %c16_103] : memref<128x32xf32, #tpu.memory_space<vmem>>, vector<8x16xf32>
    tpu.vector_store %arg5[%355, %c16_103], %352 {strides = array<i32>} : memref<128x32xf32, #tpu.memory_space<vmem>>, vector<8x16xf32>,
    %c12_i32 = arith.constant 12 : i32
    %cst_104 = arith.constant dense<0.000000e+00> : vector<8x128xf32>
    %357 = tpu.matmul %348, %7, %cst_104 {dimension_numbers = #tpu.dot_dimension_numbers<[1], [0], [0], [1], [0, 0, 1, 1], [], []>} : vector<8x32xf32>, vector<32x128xf32>, vector<8x128xf32> -> vector<8x128xf32>
    %c8_i32_105 = arith.constant 8 : i32
    %358 = arith.muli %c12_i32, %c8_i32_105 : i32
    %359 = arith.index_cast %358 : i32 to index
    %c0_106 = arith.constant 0 : index
    %360 = vector.load %arg6[%359, %c0_106] : memref<128x128xf32, #tpu.memory_space<vmem>>, vector<8x128xf32>
    %361 = arith.addf %360, %357 : vector<8x128xf32>
    %362 = vector.extract_strided_slice %361 {offsets = [0, 0], sizes = [8, 96], strides = [1, 1]} : vector<8x128xf32> to vector<8x96xf32>
    %363 = arith.negf %362 : vector<8x96xf32>
    %364 = math.exp %363 : vector<8x96xf32>
    %cst_107 = arith.constant 1.000000e+00 : f32
    %365 = vector.broadcast %cst_107 : f32 to vector<8x96xf32>
    %366 = arith.addf %365, %364 : vector<8x96xf32>
    %367 = arith.divf %365, %366 : vector<8x96xf32>
    %368 = vector.extract_strided_slice %361 {offsets = [0, 96], sizes = [8, 32], strides = [1, 1]} : vector<8x128xf32> to vector<8x32xf32>
    %369 = math.tanh %368 : vector<8x32xf32>
    %370 = vector.extract_strided_slice %367 {offsets = [0, 32], sizes = [8, 32], strides = [1, 1]} : vector<8x96xf32> to vector<8x32xf32>
    %371 = arith.mulf %370, %345 : vector<8x32xf32>
    %372 = vector.extract_strided_slice %367 {offsets = [0, 0], sizes = [8, 32], strides = [1, 1]} : vector<8x96xf32> to vector<8x32xf32>
    %373 = arith.mulf %372, %369 : vector<8x32xf32>
    %374 = arith.addf %371, %373 : vector<8x32xf32>
    %375 = vector.extract_strided_slice %367 {offsets = [0, 64], sizes = [8, 32], strides = [1, 1]} : vector<8x96xf32> to vector<8x32xf32>
    %376 = math.tanh %374 : vector<8x32xf32>
    %377 = arith.mulf %375, %376 : vector<8x32xf32>
    %378 = vector.extract_strided_slice %377 {offsets = [0, 0], sizes = [8, 16], strides = [1, 1]} : vector<8x32xf32> to vector<8x16xf32>
    %379 = arith.index_cast %358 : i32 to index
    %c0_108 = arith.constant 0 : index
    %380 = vector.load %arg5[%379, %c0_108] : memref<128x32xf32, #tpu.memory_space<vmem>>, vector<8x16xf32>
    tpu.vector_store %arg5[%379, %c0_108], %378 {strides = array<i32>} : memref<128x32xf32, #tpu.memory_space<vmem>>, vector<8x16xf32>,
    %381 = vector.extract_strided_slice %377 {offsets = [0, 16], sizes = [8, 16], strides = [1, 1]} : vector<8x32xf32> to vector<8x16xf32>
    %c15_i32_109 = arith.constant 15 : i32
    %382 = arith.subi %c15_i32_109, %c12_i32 : i32
    %c8_i32_110 = arith.constant 8 : i32
    %383 = arith.muli %382, %c8_i32_110 : i32
    %384 = arith.index_cast %383 : i32 to index
    %c16_111 = arith.constant 16 : index
    %385 = vector.load %arg5[%384, %c16_111] : memref<128x32xf32, #tpu.memory_space<vmem>>, vector<8x16xf32>
    tpu.vector_store %arg5[%384, %c16_111], %381 {strides = array<i32>} : memref<128x32xf32, #tpu.memory_space<vmem>>, vector<8x16xf32>,
    %c13_i32 = arith.constant 13 : i32
    %cst_112 = arith.constant dense<0.000000e+00> : vector<8x128xf32>
    %386 = tpu.matmul %377, %7, %cst_112 {dimension_numbers = #tpu.dot_dimension_numbers<[1], [0], [0], [1], [0, 0, 1, 1], [], []>} : vector<8x32xf32>, vector<32x128xf32>, vector<8x128xf32> -> vector<8x128xf32>
    %c8_i32_113 = arith.constant 8 : i32
    %387 = arith.muli %c13_i32, %c8_i32_113 : i32
    %388 = arith.index_cast %387 : i32 to index
    %c0_114 = arith.constant 0 : index
    %389 = vector.load %arg6[%388, %c0_114] : memref<128x128xf32, #tpu.memory_space<vmem>>, vector<8x128xf32>
    %390 = arith.addf %389, %386 : vector<8x128xf32>
    %391 = vector.extract_strided_slice %390 {offsets = [0, 0], sizes = [8, 96], strides = [1, 1]} : vector<8x128xf32> to vector<8x96xf32>
    %392 = arith.negf %391 : vector<8x96xf32>
    %393 = math.exp %392 : vector<8x96xf32>
    %cst_115 = arith.constant 1.000000e+00 : f32
    %394 = vector.broadcast %cst_115 : f32 to vector<8x96xf32>
    %395 = arith.addf %394, %393 : vector<8x96xf32>
    %396 = arith.divf %394, %395 : vector<8x96xf32>
    %397 = vector.extract_strided_slice %390 {offsets = [0, 96], sizes = [8, 32], strides = [1, 1]} : vector<8x128xf32> to vector<8x32xf32>
    %398 = math.tanh %397 : vector<8x32xf32>
    %399 = vector.extract_strided_slice %396 {offsets = [0, 32], sizes = [8, 32], strides = [1, 1]} : vector<8x96xf32> to vector<8x32xf32>
    %400 = arith.mulf %399, %374 : vector<8x32xf32>
    %401 = vector.extract_strided_slice %396 {offsets = [0, 0], sizes = [8, 32], strides = [1, 1]} : vector<8x96xf32> to vector<8x32xf32>
    %402 = arith.mulf %401, %398 : vector<8x32xf32>
    %403 = arith.addf %400, %402 : vector<8x32xf32>
    %404 = vector.extract_strided_slice %396 {offsets = [0, 64], sizes = [8, 32], strides = [1, 1]} : vector<8x96xf32> to vector<8x32xf32>
    %405 = math.tanh %403 : vector<8x32xf32>
    %406 = arith.mulf %404, %405 : vector<8x32xf32>
    %407 = vector.extract_strided_slice %406 {offsets = [0, 0], sizes = [8, 16], strides = [1, 1]} : vector<8x32xf32> to vector<8x16xf32>
    %408 = arith.index_cast %387 : i32 to index
    %c0_116 = arith.constant 0 : index
    %409 = vector.load %arg5[%408, %c0_116] : memref<128x32xf32, #tpu.memory_space<vmem>>, vector<8x16xf32>
    tpu.vector_store %arg5[%408, %c0_116], %407 {strides = array<i32>} : memref<128x32xf32, #tpu.memory_space<vmem>>, vector<8x16xf32>,
    %410 = vector.extract_strided_slice %406 {offsets = [0, 16], sizes = [8, 16], strides = [1, 1]} : vector<8x32xf32> to vector<8x16xf32>
    %c15_i32_117 = arith.constant 15 : i32
    %411 = arith.subi %c15_i32_117, %c13_i32 : i32
    %c8_i32_118 = arith.constant 8 : i32
    %412 = arith.muli %411, %c8_i32_118 : i32
    %413 = arith.index_cast %412 : i32 to index
    %c16_119 = arith.constant 16 : index
    %414 = vector.load %arg5[%413, %c16_119] : memref<128x32xf32, #tpu.memory_space<vmem>>, vector<8x16xf32>
    tpu.vector_store %arg5[%413, %c16_119], %410 {strides = array<i32>} : memref<128x32xf32, #tpu.memory_space<vmem>>, vector<8x16xf32>,
    %c14_i32 = arith.constant 14 : i32
    %cst_120 = arith.constant dense<0.000000e+00> : vector<8x128xf32>
    %415 = tpu.matmul %406, %7, %cst_120 {dimension_numbers = #tpu.dot_dimension_numbers<[1], [0], [0], [1], [0, 0, 1, 1], [], []>} : vector<8x32xf32>, vector<32x128xf32>, vector<8x128xf32> -> vector<8x128xf32>
    %c8_i32_121 = arith.constant 8 : i32
    %416 = arith.muli %c14_i32, %c8_i32_121 : i32
    %417 = arith.index_cast %416 : i32 to index
    %c0_122 = arith.constant 0 : index
    %418 = vector.load %arg6[%417, %c0_122] : memref<128x128xf32, #tpu.memory_space<vmem>>, vector<8x128xf32>
    %419 = arith.addf %418, %415 : vector<8x128xf32>
    %420 = vector.extract_strided_slice %419 {offsets = [0, 0], sizes = [8, 96], strides = [1, 1]} : vector<8x128xf32> to vector<8x96xf32>
    %421 = arith.negf %420 : vector<8x96xf32>
    %422 = math.exp %421 : vector<8x96xf32>
    %cst_123 = arith.constant 1.000000e+00 : f32
    %423 = vector.broadcast %cst_123 : f32 to vector<8x96xf32>
    %424 = arith.addf %423, %422 : vector<8x96xf32>
    %425 = arith.divf %423, %424 : vector<8x96xf32>
    %426 = vector.extract_strided_slice %419 {offsets = [0, 96], sizes = [8, 32], strides = [1, 1]} : vector<8x128xf32> to vector<8x32xf32>
    %427 = math.tanh %426 : vector<8x32xf32>
    %428 = vector.extract_strided_slice %425 {offsets = [0, 32], sizes = [8, 32], strides = [1, 1]} : vector<8x96xf32> to vector<8x32xf32>
    %429 = arith.mulf %428, %403 : vector<8x32xf32>
    %430 = vector.extract_strided_slice %425 {offsets = [0, 0], sizes = [8, 32], strides = [1, 1]} : vector<8x96xf32> to vector<8x32xf32>
    %431 = arith.mulf %430, %427 : vector<8x32xf32>
    %432 = arith.addf %429, %431 : vector<8x32xf32>
    %433 = vector.extract_strided_slice %425 {offsets = [0, 64], sizes = [8, 32], strides = [1, 1]} : vector<8x96xf32> to vector<8x32xf32>
    %434 = math.tanh %432 : vector<8x32xf32>
    %435 = arith.mulf %433, %434 : vector<8x32xf32>
    %436 = vector.extract_strided_slice %435 {offsets = [0, 0], sizes = [8, 16], strides = [1, 1]} : vector<8x32xf32> to vector<8x16xf32>
    %437 = arith.index_cast %416 : i32 to index
    %c0_124 = arith.constant 0 : index
    %438 = vector.load %arg5[%437, %c0_124] : memref<128x32xf32, #tpu.memory_space<vmem>>, vector<8x16xf32>
    tpu.vector_store %arg5[%437, %c0_124], %436 {strides = array<i32>} : memref<128x32xf32, #tpu.memory_space<vmem>>, vector<8x16xf32>,
    %439 = vector.extract_strided_slice %435 {offsets = [0, 16], sizes = [8, 16], strides = [1, 1]} : vector<8x32xf32> to vector<8x16xf32>
    %c15_i32_125 = arith.constant 15 : i32
    %440 = arith.subi %c15_i32_125, %c14_i32 : i32
    %c8_i32_126 = arith.constant 8 : i32
    %441 = arith.muli %440, %c8_i32_126 : i32
    %442 = arith.index_cast %441 : i32 to index
    %c16_127 = arith.constant 16 : index
    %443 = vector.load %arg5[%442, %c16_127] : memref<128x32xf32, #tpu.memory_space<vmem>>, vector<8x16xf32>
    tpu.vector_store %arg5[%442, %c16_127], %439 {strides = array<i32>} : memref<128x32xf32, #tpu.memory_space<vmem>>, vector<8x16xf32>,
    %c15_i32_128 = arith.constant 15 : i32
    %cst_129 = arith.constant dense<0.000000e+00> : vector<8x128xf32>
    %444 = tpu.matmul %435, %7, %cst_129 {dimension_numbers = #tpu.dot_dimension_numbers<[1], [0], [0], [1], [0, 0, 1, 1], [], []>} : vector<8x32xf32>, vector<32x128xf32>, vector<8x128xf32> -> vector<8x128xf32>
    %c8_i32_130 = arith.constant 8 : i32
    %445 = arith.muli %c15_i32_128, %c8_i32_130 : i32
    %446 = arith.index_cast %445 : i32 to index
    %c0_131 = arith.constant 0 : index
    %447 = vector.load %arg6[%446, %c0_131] : memref<128x128xf32, #tpu.memory_space<vmem>>, vector<8x128xf32>
    %448 = arith.addf %447, %444 : vector<8x128xf32>
    %449 = vector.extract_strided_slice %448 {offsets = [0, 0], sizes = [8, 96], strides = [1, 1]} : vector<8x128xf32> to vector<8x96xf32>
    %450 = arith.negf %449 : vector<8x96xf32>
    %451 = math.exp %450 : vector<8x96xf32>
    %cst_132 = arith.constant 1.000000e+00 : f32
    %452 = vector.broadcast %cst_132 : f32 to vector<8x96xf32>
    %453 = arith.addf %452, %451 : vector<8x96xf32>
    %454 = arith.divf %452, %453 : vector<8x96xf32>
    %455 = vector.extract_strided_slice %448 {offsets = [0, 96], sizes = [8, 32], strides = [1, 1]} : vector<8x128xf32> to vector<8x32xf32>
    %456 = math.tanh %455 : vector<8x32xf32>
    %457 = vector.extract_strided_slice %454 {offsets = [0, 32], sizes = [8, 32], strides = [1, 1]} : vector<8x96xf32> to vector<8x32xf32>
    %458 = arith.mulf %457, %432 : vector<8x32xf32>
    %459 = vector.extract_strided_slice %454 {offsets = [0, 0], sizes = [8, 32], strides = [1, 1]} : vector<8x96xf32> to vector<8x32xf32>
    %460 = arith.mulf %459, %456 : vector<8x32xf32>
    %461 = arith.addf %458, %460 : vector<8x32xf32>
    %462 = vector.extract_strided_slice %454 {offsets = [0, 64], sizes = [8, 32], strides = [1, 1]} : vector<8x96xf32> to vector<8x32xf32>
    %463 = math.tanh %461 : vector<8x32xf32>
    %464 = arith.mulf %462, %463 : vector<8x32xf32>
    %465 = vector.extract_strided_slice %464 {offsets = [0, 0], sizes = [8, 16], strides = [1, 1]} : vector<8x32xf32> to vector<8x16xf32>
    %466 = arith.index_cast %445 : i32 to index
    %c0_133 = arith.constant 0 : index
    %467 = vector.load %arg5[%466, %c0_133] : memref<128x32xf32, #tpu.memory_space<vmem>>, vector<8x16xf32>
    tpu.vector_store %arg5[%466, %c0_133], %465 {strides = array<i32>} : memref<128x32xf32, #tpu.memory_space<vmem>>, vector<8x16xf32>,
    %468 = vector.extract_strided_slice %464 {offsets = [0, 16], sizes = [8, 16], strides = [1, 1]} : vector<8x32xf32> to vector<8x16xf32>
    %c15_i32_134 = arith.constant 15 : i32
    %469 = arith.subi %c15_i32_134, %c15_i32_128 : i32
    %c8_i32_135 = arith.constant 8 : i32
    %470 = arith.muli %469, %c8_i32_135 : i32
    %471 = arith.index_cast %470 : i32 to index
    %c16_136 = arith.constant 16 : index
    %472 = vector.load %arg5[%471, %c16_136] : memref<128x32xf32, #tpu.memory_space<vmem>>, vector<8x16xf32>
    tpu.vector_store %arg5[%471, %c16_136], %468 {strides = array<i32>} : memref<128x32xf32, #tpu.memory_space<vmem>>, vector<8x16xf32>,
    %c16_i32 = arith.constant 16 : i32
    return
  }
  func.func @transform_0(%arg0: i32) -> (i32, i32) {
    %c0_i32 = arith.constant 0 : i32
    %c0_i32_0 = arith.constant 0 : i32
    %c0_i32_1 = arith.constant 0 : i32
    return %c0_i32, %c0_i32_0 : i32, i32
  }
  func.func @transform_1(%arg0: i32) -> (i32, i32) {
    %c0_i32 = arith.constant 0 : i32
    %c0_i32_0 = arith.constant 0 : i32
    %c0_i32_1 = arith.constant 0 : i32
    return %c0_i32, %c0_i32_0 : i32, i32
  }
  func.func @transform_2(%arg0: i32) -> (i32, i32) {
    %c0_i32 = arith.constant 0 : i32
    %c0_i32_0 = arith.constant 0 : i32
    %c0_i32_1 = arith.constant 0 : i32
    return %c0_i32, %c0_i32_0 : i32, i32
  }
  func.func @transform_3(%arg0: i32) -> (i32, i32) {
    %c0_i32 = arith.constant 0 : i32
    %c0_i32_0 = arith.constant 0 : i32
    %c0_i32_1 = arith.constant 0 : i32
    return %c0_i32, %c0_i32_0 : i32, i32
  }
  func.func @transform_4(%arg0: i32) -> (i32, i32) {
    %c0_i32 = arith.constant 0 : i32
    %c0_i32_0 = arith.constant 0 : i32
    %c0_i32_1 = arith.constant 0 : i32
    return %c0_i32, %c0_i32_0 : i32, i32
  }
}

</mosaic_0001>

<bundles_post_ra>
// kernel: tpu_custom_call.1
= control target key start
LH: loop header
LB: loop body
LE: loop exit
PB: predicated region body
PF: predicated region fallthrough
CT: control target
= control target key end

     0   :  { %v2548_v3 = vmov 0.0|0.0   ;;  %vm2549_vm0 = vmmov 0   ;;  %v2550_v4 = vmov 0.0   ;;  %vm48_vm1 = vcmask 523264   ;;  %s2551_s17 = smov 32   ;;  %s2552_s18 = smov 64   ;;  %s3042_s1 = inlined_call_operand.vmem [shape: f32[64,128], index: 1, kind: input, shape index: {}]   ;;  %s3043_s2 = inlined_call_operand.vmem [shape: f32[32,128], index: 2, kind: input, shape index: {}]   ;;  %s3044_s0 = inlined_call_operand.vmem [shape: f32[128,64], index: 0, kind: input, shape index: {}]   ;;  %s3045_s3 = inlined_call_operand.vmem [shape: f32[1,128], index: 3, kind: input, shape index: {}]   ;;  %s3046_s4 = inlined_call_operand.vmem [shape: f32[128,32], index: 4, kind: output, shape index: {}]  }
   0x1   :  { %v33_v0 = vld [vmem:[%s3042_s1] sm:$0xff]  ;;  %v34_v1 = vld [vmem:[%s3042_s1 + $0x8] sm:$0xff]  ;;  %v35_v2 = vld [vmem:[%s3042_s1 + $0x10] sm:$0xff]  ;;  %2318 = vmatprep.subr.bf16.mxu1 %v2548_v3  ;;  %2134 = vmatprep.mubr.msk.f32.mxu1 %vm2549_vm0, %v2550_v4  ;;  %vm366_vm2 = vcmask 130048   ;;  %vm368_vm3 = vcmask 261248   ;;  %vm262_vm4 = vcmask 261120  }
   0x2   :  { %v2302_v5 = vpack.c.bf16 %v34_v1, %v33_v0  ;;  %v36_v6 = vld [vmem:[%s3042_s1 + $0x18] sm:$0xff]  ;;  %v37_v7 = vld [vmem:[%s3042_s1 + $0x20] sm:$0xff]  ;;  %v38_v9 = vld [vmem:[%s3042_s1 + $0x28] sm:$0xff] }
   0x3   :  { %v2306_v8 = vpack.c.bf16 %v36_v6, %v35_v2  ;;  %v258_v10 = vld [vmem:[%s3043_s2] sm:$0xff]  ;;  %v259_v11 = vld [vmem:[%s3043_s2 + $0x8] sm:$0xff]  ;;  %v260_v14 = vld [vmem:[%s3043_s2 + $0x10] sm:$0xff]  ;;  %v2310_v16 = vpack.c.bf16 %v38_v9, %v37_v7 }
   0x4   :  { %2303 = vmatprep.subr.bf16.mxu0 %v2302_v5  ;;  %v2605_v12 = vpack.c.bf16 %v259_v11, %v258_v10  ;;  %v17_v13 = vld [vmem:[%s3044_s0] sm:$0xff]  ;;  %v261_v15 = vld [vmem:[%s3043_s2 + $0x18] sm:$0xff]  ;;  %v39_v18 = vld [vmem:[%s3042_s1 + $0x30] sm:$0xff] }
   0x5   :  { %2305 = vmatpush3.bf16.msra.mxu0 %v2302_v5  ;;  %2102 = vmatprep.mubr.msk.f32.mxu0 %vm48_vm1, %v17_v13  ;;  %v2618_v17 = vpack.c.bf16 %v261_v15, %v260_v14  ;;  %v40_v19 = vld [vmem:[%s3042_s1 + $0x38] sm:$0xff]  ;;  %v18_v21 = vld [vmem:[%s3044_s0 + $0x8] sm:$0xff]  ;;  %v2648_v24 = vld [vmem:[%s3045_s3] ss:$0 sm:$0xff] }
   0x6   :  { %2307 = vmatprep.subr.bf16.mxu0 %v2306_v8  ;;  %2320 = vmatpush3.bf16.msra.mxu1 %v2605_v12  ;;  %v2314_v20 = vpack.c.bf16 %v40_v19, %v39_v18  ;;  %v19_v57 = vld [vmem:[%s3044_s0 + $0x10] sm:$0xff]  ;;  %v20_v58 = vld [vmem:[%s3044_s0 + $0x18] sm:$0xff] }
   0x7   :  { %2321 = vmatprep.subr.bf16.mxu1 %v2548_v3 }
   0x9   :  { %2309 = vmatpush3.bf16.msra.mxu0 %v2306_v8 }
   0xa   :  { %2311 = vmatprep.subr.bf16.mxu0 %v2310_v16  ;;  %2323 = vmatpush3.bf16.msra.mxu1 %v2618_v17 }
   0xb   :  { %2324 = vmatprep.subr.bf16.mxu1 %v2548_v3 }
   0xd   :  { %2313 = vmatpush3.bf16.msra.mxu0 %v2310_v16  ;;  %2135 = vmatmul.mubr.f32.vlgmr.msra.gmra.mrb[0].mxu1 %v2550_v4 }
   0xe   :  { %2315 = vmatprep.subr.bf16.mxu0 %v2314_v20  ;;  %2326 = vmatpush3.bf16.msra.mxu1 %v2605_v12 }
   0xf   :  { %2327 = vmatprep.subr.bf16.mxu1 %v2548_v3  ;;  %2145 = vmatprep.mubr.msk.f32.mxu1 %vm2549_vm0, %v2550_v4 }
  0x11   :  { %2317 = vmatpush3.bf16.msra.mxu0 %v2314_v20 }
  0x12   :  { %2329 = vmatpush3.bf16.msra.mxu1 %v2618_v17  ;;  %2348 = vmatprep.subr.bf16.mxu0 %v2548_v3 }
  0x13   :  { %2330 = vmatprep.subr.bf16.mxu1 %v2548_v3 }
  0x14   :  { %2103 = vmatmul.mubr.msk.f32.vlgmr.msra.gmra.mrb[0].mxu0 %vm48_vm1, %v18_v21 }
  0x15   :  { %2350 = vmatpush3.bf16.msra.mxu0 %v2605_v12  ;;  %2105 = vmatprep.mubr.msk.f32.mxu0 %vm48_vm1, %v19_v57 }
  0x16   :  { %2351 = vmatprep.subr.bf16.mxu0 %v2548_v3 }
  0x18   :  { %2106 = vmatmul.mubr.msk.f32.gmra.mrb[2].mxu0 %vm48_vm1, %v20_v58 }
  0x19   :  { %2353 = vmatpush3.bf16.msra.mxu0 %v2618_v17 }
  0x1a   :  { %2360 = vmatprep.subr.bf16.mxu0 %v2548_v3 }
  0xe0   :  { %v332_v22 = vpop.f32.mrb[0].mxu1 }
  0xe1   :  { %v2136_v23 = vpop.f32.mrb[1].mxu1 }
  0xe7   :  { %v2104_v25 = vpop.f32.mrb[0].mxu0 }
  0xe8   :  { %v163_v26 = vpop.f32.mrb[1].mxu0  ;;  %v169_v43 = vadd.f32 %v2104_v25, %v2648_v24 }
  0xe9   :  { %v164_v27 = vadd.f32 %v2648_v24, %v163_v26 }
  0xeb   :  { %v337_v28 = vadd.f32 %v332_v22, %v164_v27  ;;  %v2107_v62 = vpop.f32.mrb[2].mxu0 }
  0xec   :  { %v173_v63 = vpop.f32.mrb[3].mxu0  ;;  %v179_v23 = vadd.f32 %v2107_v62, %v2648_v24  ;;  %v25_v62 = vld [vmem:[%s3044_s0 + $0x40] sm:$0xff] }
  0xed   :  { %2419 = vtanh.f32 %v337_v28  ;;  %v1951_v30 = vmul.f32 -1.442695, %v337_v28  ;;  %v174_v1 = vadd.f32 %v2648_v24, %v173_v63  ;;  %v26_v63 = vld [vmem:[%s3044_s0 + $0x48] sm:$0xff] }
  0xef   :  { %2421 = vpow2.f32 %v1951_v30 }
  0xf7   :  { %v2420_v29 = vpop.eup %2419 }
  0xf8   :  { %347 = vrot.lane.b32.xlu0 %v2420_v29, %s2551_s17 }
  0xf9   :  { %v2422_v31 = vpop.eup %2421 }
  0xfa   :  { %v341_v32 = vadd.f32 1.0, %v2422_v31 }
  0xfc   :  { %2423 = vrcp.f32 %v341_v32 }
 0x106   :  { %v2424_v33 = vpop.eup %2423 }
 0x107   :  { %v345_v36 = vmul.f32 0.0, %v2424_v33 }
 0x16a   :  { %v348_v34 = vpop.permute.xlu0 %347 }
 0x16b   :  { %v350_v35 = vmul.f32 %v2424_v33, %v348_v34 }
 0x16d   :  { %352 = vrot.lane.b32.xlu0 %v350_v35, %s2551_s17 }
 0x1df   :  { %v353_v37 = vpop.permute.xlu0 %352 }
 0x1e0   :  { %v355_v38 = vadd.f32 %v353_v37, %v345_v36 }
 0x1e2   :  { %2425 = vtanh.f32 %v355_v38 }
 0x1ec   :  { %v2426_v39 = vpop.eup %2425 }
 0x1ed   :  { %358 = vrot.lane.b32.xlu1 %v2426_v39, %s2551_s17  ;;  %v22_v39 = vld [vmem:[%s3044_s0 + $0x28] sm:$0xff] }
 0x25f   :  { %v359_v40 = vpop.permute.xlu1 %358 }
 0x260   :  { %v361_v41 = vmul.f32 %v2424_v33, %v359_v40 }
 0x262   :  { %363 = vrot.lane.b32.xlu1 %v361_v41, %s2552_s18 }
 0x2d4   :  { %v364_v42 = vpop.permute.xlu1 %363 }
 0x2d5   :  { %367 = vst.msk [vmem:[%s3046_s4] sm:$0xff] %vm366_vm2, %v364_v42  ;;  %2146 = vmatmul.mubr.msk.f32.vlgmr.msra.gmra.mrb[2].mxu1 %vm262_vm4, %v364_v42 }
 0x2d6   :  { %369 = vst.msk [vmem:[%s3046_s4 + $0x78] sm:$0xff] %vm368_vm3, %v364_v42  ;;  %2332 = vmatpush3.bf16.msra.mxu1 %v2605_v12  ;;  %2156 = vmatprep.mubr.msk.f32.mxu1 %vm2549_vm0, %v2550_v4 }
 0x2d7   :  { %2333 = vmatprep.subr.bf16.mxu1 %v2548_v3 }
 0x2da   :  { %2335 = vmatpush3.bf16.msra.mxu1 %v2618_v17 }
 0x2db   :  { %2336 = vmatprep.subr.bf16.mxu1 %v2548_v3 }
 0x3a8   :  { %v438_v44 = vpop.f32.mrb[2].mxu1 }
 0x3a9   :  { %v443_v45 = vadd.f32 %v438_v44, %v169_v43  ;;  %v2147_v46 = vpop.f32.mrb[3].mxu1 }
 0x3ab   :  { %2427 = vtanh.f32 %v443_v45  ;;  %v1953_v48 = vmul.f32 -1.442695, %v443_v45 }
 0x3ad   :  { %2429 = vpow2.f32 %v1953_v48 }
 0x3b5   :  { %v2428_v47 = vpop.eup %2427 }
 0x3b6   :  { %453 = vrot.lane.b32.xlu0 %v2428_v47, %s2551_s17 }
 0x3b7   :  { %v2430_v49 = vpop.eup %2429 }
 0x3b8   :  { %v447_v50 = vadd.f32 1.0, %v2430_v49 }
 0x3ba   :  { %2431 = vrcp.f32 %v447_v50 }
 0x3c4   :  { %v2432_v51 = vpop.eup %2431 }
 0x3c5   :  { %v451_v54 = vmul.f32 %v2432_v51, %v355_v38  ;;  %v21_v38 = vld [vmem:[%s3044_s0 + $0x20] sm:$0xff] }
 0x3c6   :  { %2108 = vmatprep.mubr.msk.f32.mxu0 %vm48_vm1, %v21_v38 }
 0x3c7   :  { %2109 = vmatmul.mubr.msk.f32.gmra.mrb[4].mxu0 %vm48_vm1, %v22_v39 }
 0x428   :  { %v454_v52 = vpop.permute.xlu0 %453 }
 0x429   :  { %v456_v53 = vmul.f32 %v2432_v51, %v454_v52 }
 0x42b   :  { %458 = vrot.lane.b32.xlu1 %v456_v53, %s2551_s17 }
 0x49a   :  { %v2731_v43 = vpop.f32.mrb[4].mxu0 }
 0x49b   :  { %v183_v44 = vpop.f32.mrb[5].mxu0 }
 0x49c   :  { %v184_v46 = vadd.f32 %v2648_v24, %v183_v44 }
 0x49d   :  { %v459_v55 = vpop.permute.xlu1 %458 }
 0x49e   :  { %v461_v56 = vadd.f32 %v459_v55, %v451_v54 }
 0x4a0   :  { %2433 = vtanh.f32 %v461_v56 }
 0x4aa   :  { %v2434_v59 = vpop.eup %2433 }
 0x4ab   :  { %464 = vrot.lane.b32.xlu0 %v2434_v59, %s2551_s17 }
 0x51d   :  { %v465_v60 = vpop.permute.xlu0 %464 }
 0x51e   :  { %v467_v61 = vmul.f32 %v2432_v51, %v465_v60  ;;  %v23_v60 = vld [vmem:[%s3044_s0 + $0x30] sm:$0xff] }
 0x51f   :  { %2111 = vmatprep.mubr.msk.f32.mxu0 %vm48_vm1, %v23_v60 }
 0x520   :  { %469 = vrot.lane.b32.xlu1 %v467_v61, %s2552_s18  ;;  %v24_v61 = vld [vmem:[%s3044_s0 + $0x38] sm:$0xff] }
 0x521   :  { %2112 = vmatmul.mubr.msk.f32.gmra.mrb[6].mxu0 %vm48_vm1, %v24_v61 }
 0x522   :  { %2114 = vmatprep.mubr.msk.f32.mxu0 %vm48_vm1, %v25_v62 }
 0x525   :  { %2115 = vmatmul.mubr.msk.f32.gmra.mrb[8].mxu0 %vm48_vm1, %v26_v63 }
 0x592   :  { %v470_v0 = vpop.permute.xlu1 %469 }
 0x593   :  { %472 = vst.msk [vmem:[%s3046_s4 + $0x8] sm:$0xff] %vm366_vm2, %v470_v0  ;;  %2157 = vmatmul.mubr.msk.f32.vlgmr.msra.gmra.mrb[4].mxu1 %vm262_vm4, %v470_v0 }
 0x594   :  { %473 = vst.msk [vmem:[%s3046_s4 + $0x70] sm:$0xff] %vm368_vm3, %v470_v0  ;;  %2338 = vmatpush3.bf16.msra.mxu1 %v2605_v12  ;;  %2167 = vmatprep.mubr.msk.f32.mxu1 %vm2549_vm0, %v2550_v4  ;;  %v27_v0 = vld [vmem:[%s3044_s0 + $0x50] sm:$0xff] }
 0x595   :  { %2339 = vmatprep.subr.bf16.mxu1 %v2548_v3  ;;  %2117 = vmatprep.mubr.msk.f32.mxu0 %vm48_vm1, %v27_v0 }
 0x598   :  { %2341 = vmatpush3.bf16.msra.mxu1 %v2618_v17 }
 0x599   :  { %2342 = vmatprep.subr.bf16.mxu1 %v2548_v3 }
 0x666   :  { %v542_v2 = vpop.f32.mrb[4].mxu1 }
 0x667   :  { %v547_v5 = vadd.f32 %v542_v2, %v174_v1  ;;  %v2158_v6 = vpop.f32.mrb[5].mxu1  ;;  %v28_v1 = vld [vmem:[%s3044_s0 + $0x58] sm:$0xff]  ;;  %v29_v2 = vld [vmem:[%s3044_s0 + $0x60] sm:$0xff] }
 0x668   :  { %2118 = vmatmul.mubr.msk.f32.gmra.mrb[10].mxu0 %vm48_vm1, %v28_v1  ;;  %v30_v6 = vld [vmem:[%s3044_s0 + $0x68] sm:$0xff] }
 0x669   :  { %2435 = vtanh.f32 %v547_v5  ;;  %v1955_v8 = vmul.f32 -1.442695, %v547_v5  ;;  %2120 = vmatprep.mubr.msk.f32.mxu0 %vm48_vm1, %v29_v2 }
 0x66b   :  { %2437 = vpow2.f32 %v1955_v8  ;;  %v32_v8 = vld [vmem:[%s3044_s0 + $0x78] sm:$0xff] }
 0x66c   :  { %2121 = vmatmul.mubr.msk.f32.gmra.mrb[12].mxu0 %vm48_vm1, %v30_v6 }
 0x673   :  { %v2436_v7 = vpop.eup %2435 }
 0x674   :  { %557 = vrot.lane.b32.xlu0 %v2436_v7, %s2551_s17  ;;  %v31_v7 = vld [vmem:[%s3044_s0 + $0x70] sm:$0xff] }
 0x675   :  { %v2438_v9 = vpop.eup %2437  ;;  %2123 = vmatprep.mubr.msk.f32.mxu0 %vm48_vm1, %v31_v7 }
 0x676   :  { %v551_v10 = vadd.f32 1.0, %v2438_v9  ;;  %2124 = vmatmul.mubr.msk.f32.gmra.mrb[14].mxu0 %vm48_vm1, %v32_v8 }
 0x677   :  { %2189 = vmatprep.mubr.msk.f32.mxu0 %vm2549_vm0, %v2550_v4 }
 0x678   :  { %2439 = vrcp.f32 %v551_v10 }
 0x682   :  { %v2440_v11 = vpop.eup %2439 }
 0x683   :  { %v555_v15 = vmul.f32 %v2440_v11, %v461_v56 }
 0x6e6   :  { %v558_v13 = vpop.permute.xlu0 %557 }
 0x6e7   :  { %v560_v14 = vmul.f32 %v2440_v11, %v558_v13 }
 0x6e9   :  { %562 = vrot.lane.b32.xlu1 %v560_v14, %s2551_s17 }
 0x75b   :  { %v563_v16 = vpop.permute.xlu1 %562 }
 0x75c   :  { %v565_v18 = vadd.f32 %v563_v16, %v555_v15 }
 0x75e   :  { %2441 = vtanh.f32 %v565_v18 }
 0x768   :  { %v2442_v19 = vpop.eup %2441 }
 0x769   :  { %568 = vrot.lane.b32.xlu0 %v2442_v19, %s2551_s17 }
 0x7db   :  { %v569_v20 = vpop.permute.xlu0 %568 }
 0x7dc   :  { %v571_v21 = vmul.f32 %v2440_v11, %v569_v20  ;;  %v2798_v11 = vpop.f32.mrb[6].mxu0 }
 0x7dd   :  { %v193_v13 = vpop.f32.mrb[7].mxu0  ;;  %v199_v61 = vadd.f32 %v2798_v11, %v2648_v24 }
 0x7de   :  { %573 = vrot.lane.b32.xlu1 %v571_v21, %s2552_s18  ;;  %v2800_v14 = vpop.f32.mrb[8].mxu0 }
 0x7df   :  { %v2802_v15 = vpop.f32.mrb[9].mxu0 }
 0x7e0   :  { %v2804_v16 = vpop.f32.mrb[10].mxu0 }
 0x850   :  { %v574_v22 = vpop.permute.xlu1 %573 }
 0x851   :  { %576 = vst.msk [vmem:[%s3046_s4 + $0x10] sm:$0xff] %vm366_vm2, %v574_v22  ;;  %2168 = vmatmul.mubr.msk.f32.vlgmr.msra.gmra.mrb[6].mxu1 %vm262_vm4, %v574_v22 }
 0x852   :  { %577 = vst.msk [vmem:[%s3046_s4 + $0x68] sm:$0xff] %vm368_vm3, %v574_v22  ;;  %2344 = vmatpush3.bf16.msra.mxu1 %v2605_v12  ;;  %2178 = vmatprep.mubr.msk.f32.mxu1 %vm2549_vm0, %v2550_v4 }
 0x853   :  { %2345 = vmatprep.subr.bf16.mxu1 %v2548_v3 }
 0x856   :  { %2347 = vmatpush3.bf16.msra.mxu1 %v2618_v17 }
 0x857   :  { %2354 = vmatprep.subr.bf16.mxu1 %v2548_v3 }
 0x924   :  { %v646_v25 = vpop.f32.mrb[6].mxu1 }
 0x925   :  { %v651_v26 = vadd.f32 %v646_v25, %v179_v23  ;;  %v2169_v27 = vpop.f32.mrb[7].mxu1  ;;  %v189_v25 = vadd.f32 %v2731_v43, %v2648_v24  ;;  %v194_v43 = vadd.f32 %v2648_v24, %v193_v13 }
 0x927   :  { %2443 = vtanh.f32 %v651_v26  ;;  %v1957_v29 = vmul.f32 -1.442695, %v651_v26 }
 0x929   :  { %2445 = vpow2.f32 %v1957_v29 }
 0x931   :  { %v2444_v28 = vpop.eup %2443 }
 0x932   :  { %661 = vrot.lane.b32.xlu0 %v2444_v28, %s2551_s17 }
 0x933   :  { %v2446_v30 = vpop.eup %2445 }
 0x934   :  { %v655_v31 = vadd.f32 1.0, %v2446_v30 }
 0x936   :  { %2447 = vrcp.f32 %v655_v31 }
 0x940   :  { %v2448_v32 = vpop.eup %2447 }
 0x941   :  { %v659_v35 = vmul.f32 %v2448_v32, %v565_v18  ;;  %v2806_v18 = vpop.f32.mrb[11].mxu0 }
 0x942   :  { %v2808_v19 = vpop.f32.mrb[12].mxu0 }
 0x943   :  { %v2810_v20 = vpop.f32.mrb[13].mxu0 }
 0x944   :  { %v2812_v21 = vpop.f32.mrb[14].mxu0 }
 0x945   :  { %v2814_v22 = vpop.f32.mrb[15].mxu0 }
 0x9a4   :  { %v662_v33 = vpop.permute.xlu0 %661 }
 0x9a5   :  { %v664_v34 = vmul.f32 %v2448_v32, %v662_v33 }
 0x9a7   :  { %666 = vrot.lane.b32.xlu1 %v664_v34, %s2551_s17 }
 0xa19   :  { %v667_v36 = vpop.permute.xlu1 %666 }
 0xa1a   :  { %v669_v37 = vadd.f32 %v667_v36, %v659_v35 }
 0xa1c   :  { %2449 = vtanh.f32 %v669_v37 }
 0xa26   :  { %v2450_v40 = vpop.eup %2449 }
 0xa27   :  { %672 = vrot.lane.b32.xlu0 %v2450_v40, %s2551_s17 }
 0xa99   :  { %v673_v41 = vpop.permute.xlu0 %672 }
 0xa9a   :  { %v675_v42 = vmul.f32 %v2448_v32, %v673_v41 }
 0xa9c   :  { %677 = vrot.lane.b32.xlu1 %v675_v42, %s2552_s18 }
 0xb0e   :  { %v678_v45 = vpop.permute.xlu1 %677 }
 0xb0f   :  { %680 = vst.msk [vmem:[%s3046_s4 + $0x18] sm:$0xff] %vm366_vm2, %v678_v45  ;;  %2179 = vmatmul.mubr.msk.f32.vlgmr.msra.gmra.mrb[8].mxu1 %vm262_vm4, %v678_v45 }
 0xb10   :  { %681 = vst.msk [vmem:[%s3046_s4 + $0x60] sm:$0xff] %vm368_vm3, %v678_v45  ;;  %2356 = vmatpush3.bf16.msra.mxu1 %v2605_v12  ;;  %2200 = vmatprep.mubr.msk.f32.mxu1 %vm2549_vm0, %v2550_v4 }
 0xb11   :  { %2357 = vmatprep.subr.bf16.mxu1 %v2548_v3 }
 0xb14   :  { %2359 = vmatpush3.bf16.msra.mxu1 %v2618_v17 }
 0xb15   :  { %2366 = vmatprep.subr.bf16.mxu1 %v2548_v3 }
 0xbe2   :  { %v750_v47 = vpop.f32.mrb[8].mxu1 }
 0xbe3   :  { %v755_v48 = vadd.f32 %v750_v47, %v184_v46  ;;  %v2180_v49 = vpop.f32.mrb[9].mxu1 }
 0xbe5   :  { %2451 = vtanh.f32 %v755_v48  ;;  %v1959_v51 = vmul.f32 -1.442695, %v755_v48 }
 0xbe7   :  { %2453 = vpow2.f32 %v1959_v51 }
 0xbef   :  { %v2452_v50 = vpop.eup %2451 }
 0xbf0   :  { %765 = vrot.lane.b32.xlu0 %v2452_v50, %s2551_s17 }
 0xbf1   :  { %v2454_v52 = vpop.eup %2453 }
 0xbf2   :  { %v759_v53 = vadd.f32 1.0, %v2454_v52 }
 0xbf4   :  { %2455 = vrcp.f32 %v759_v53 }
 0xbfe   :  { %v2456_v54 = vpop.eup %2455 }
 0xbff   :  { %v763_v57 = vmul.f32 %v2456_v54, %v669_v37 }
 0xc62   :  { %v766_v55 = vpop.permute.xlu0 %765 }
 0xc63   :  { %v768_v56 = vmul.f32 %v2456_v54, %v766_v55 }
 0xc65   :  { %770 = vrot.lane.b32.xlu1 %v768_v56, %s2551_s17 }
 0xcd7   :  { %v771_v58 = vpop.permute.xlu1 %770 }
 0xcd8   :  { %v2751_v59 = vadd.f32 %v771_v58, %v763_v57 }
 0xcda   :  { %2457 = vtanh.f32 %v2751_v59 }
 0xce4   :  { %v2458_v5 = vpop.eup %2457 }
 0xce5   :  { %776 = vrot.lane.b32.xlu0 %v2458_v5, %s2551_s17 }
 0xd57   :  { %v777_v9 = vpop.permute.xlu0 %776 }
 0xd58   :  { %v779_v10 = vmul.f32 %v2456_v54, %v777_v9 }
 0xd5a   :  { %781 = vrot.lane.b32.xlu1 %v779_v10, %s2552_s18 }
 0xdcc   :  { %v782_v23 = vpop.permute.xlu1 %781 }
 0xdcd   :  { %784 = vst.msk [vmem:[%s3046_s4 + $0x20] sm:$0xff] %vm366_vm2, %v782_v23  ;;  %2190 = vmatmul.mubr.msk.f32.vlgmr.msra.gmra.mrb[16].mxu0 %vm262_vm4, %v782_v23 }
 0xdce   :  { %785 = vst.msk [vmem:[%s3046_s4 + $0x58] sm:$0xff] %vm368_vm3, %v782_v23  ;;  %2362 = vmatpush3.bf16.msra.mxu0 %v2605_v12  ;;  %2211 = vmatprep.mubr.msk.f32.mxu0 %vm2549_vm0, %v2550_v4 }
 0xdcf   :  { %2363 = vmatprep.subr.bf16.mxu0 %v2548_v3 }
 0xdd2   :  { %2365 = vmatpush3.bf16.msra.mxu0 %v2618_v17 }
 0xdd3   :  { %2372 = vmatprep.subr.bf16.mxu0 %v2548_v3 }
 0xea0   :  { %v854_v26 = vpop.f32.mrb[16].mxu0 }
 0xea1   :  { %v859_v27 = vadd.f32 %v854_v26, %v189_v25  ;;  %v2191_v28 = vpop.f32.mrb[17].mxu0 }
 0xea2   :  { %v204_v28 = vadd.f32 %v2648_v24, %v2802_v15 }
 0xea3   :  { %2459 = vtanh.f32 %v859_v27  ;;  %v1961_v30 = vmul.f32 -1.442695, %v859_v27 }
 0xea5   :  { %2461 = vpow2.f32 %v1961_v30 }
 0xead   :  { %v2460_v29 = vpop.eup %2459 }
 0xeae   :  { %869 = vrot.lane.b32.xlu0 %v2460_v29, %s2551_s17 }
 0xeaf   :  { %v2462_v31 = vpop.eup %2461 }
 0xeb0   :  { %v863_v32 = vadd.f32 1.0, %v2462_v31 }
 0xeb2   :  { %2463 = vrcp.f32 %v863_v32 }
 0xebc   :  { %v2464_v33 = vpop.eup %2463 }
 0xebd   :  { %v867_v36 = vmul.f32 %v2464_v33, %v2751_v59 }
 0xf20   :  { %v870_v34 = vpop.permute.xlu0 %869 }
 0xf21   :  { %v872_v35 = vmul.f32 %v2464_v33, %v870_v34 }
 0xf23   :  { %874 = vrot.lane.b32.xlu1 %v872_v35, %s2551_s17 }
 0xf95   :  { %v875_v37 = vpop.permute.xlu1 %874 }
 0xf96   :  { %v877_v38 = vadd.f32 %v875_v37, %v867_v36 }
 0xf98   :  { %2465 = vtanh.f32 %v877_v38 }
 0xfa2   :  { %v2466_v39 = vpop.eup %2465 }
 0xfa3   :  { %880 = vrot.lane.b32.xlu0 %v2466_v39, %s2551_s17 }
0x1015   :  { %v881_v40 = vpop.permute.xlu0 %880 }
0x1016   :  { %v883_v41 = vmul.f32 %v2464_v33, %v881_v40 }
0x1018   :  { %885 = vrot.lane.b32.xlu1 %v883_v41, %s2552_s18 }
0x108a   :  { %v886_v42 = vpop.permute.xlu1 %885 }
0x108b   :  { %888 = vst.msk [vmem:[%s3046_s4 + $0x28] sm:$0xff] %vm366_vm2, %v886_v42  ;;  %2201 = vmatmul.mubr.msk.f32.vlgmr.msra.gmra.mrb[10].mxu1 %vm262_vm4, %v886_v42 }
0x108c   :  { %889 = vst.msk [vmem:[%s3046_s4 + $0x50] sm:$0xff] %vm368_vm3, %v886_v42  ;;  %2368 = vmatpush3.bf16.msra.mxu1 %v2605_v12  ;;  %2222 = vmatprep.mubr.msk.f32.mxu1 %vm2549_vm0, %v2550_v4 }
0x108d   :  { %2369 = vmatprep.subr.bf16.mxu1 %v2548_v3 }
0x1090   :  { %2371 = vmatpush3.bf16.msra.mxu1 %v2618_v17 }
0x1091   :  { %2378 = vmatprep.subr.bf16.mxu1 %v2548_v3 }
0x115e   :  { %v958_v44 = vpop.f32.mrb[10].mxu1 }
0x115f   :  { %v963_v45 = vadd.f32 %v958_v44, %v194_v43  ;;  %v2202_v46 = vpop.f32.mrb[11].mxu1 }
0x1161   :  { %2467 = vtanh.f32 %v963_v45  ;;  %v1963_v48 = vmul.f32 -1.442695, %v963_v45  ;;  %v209_v45 = vadd.f32 %v2800_v14, %v2648_v24 }
0x1163   :  { %2469 = vpow2.f32 %v1963_v48 }
0x116b   :  { %v2468_v47 = vpop.eup %2467 }
0x116c   :  { %973 = vrot.lane.b32.xlu0 %v2468_v47, %s2551_s17 }
0x116d   :  { %v2470_v49 = vpop.eup %2469 }
0x116e   :  { %v967_v50 = vadd.f32 1.0, %v2470_v49 }
0x1170   :  { %2471 = vrcp.f32 %v967_v50 }
0x117a   :  { %v2472_v51 = vpop.eup %2471 }
0x117b   :  { %v971_v54 = vmul.f32 %v2472_v51, %v877_v38 }
0x11de   :  { %v974_v52 = vpop.permute.xlu0 %973 }
0x11df   :  { %v976_v53 = vmul.f32 %v2472_v51, %v974_v52 }
0x11e1   :  { %978 = vrot.lane.b32.xlu1 %v976_v53, %s2551_s17 }
0x1253   :  { %v979_v55 = vpop.permute.xlu1 %978 }
0x1254   :  { %v981_v56 = vadd.f32 %v979_v55, %v971_v54 }
0x1256   :  { %2473 = vtanh.f32 %v981_v56 }
0x1260   :  { %v2474_v57 = vpop.eup %2473 }
0x1261   :  { %984 = vrot.lane.b32.xlu0 %v2474_v57, %s2551_s17 }
0x12d3   :  { %v985_v58 = vpop.permute.xlu0 %984 }
0x12d4   :  { %v987_v59 = vmul.f32 %v2472_v51, %v985_v58 }
0x12d6   :  { %989 = vrot.lane.b32.xlu1 %v987_v59, %s2552_s18 }
0x1348   :  { %v990_v60 = vpop.permute.xlu1 %989 }
0x1349   :  { %992 = vst.msk [vmem:[%s3046_s4 + $0x30] sm:$0xff] %vm366_vm2, %v990_v60  ;;  %2212 = vmatmul.mubr.msk.f32.vlgmr.msra.gmra.mrb[18].mxu0 %vm262_vm4, %v990_v60 }
0x134a   :  { %993 = vst.msk [vmem:[%s3046_s4 + $0x48] sm:$0xff] %vm368_vm3, %v990_v60  ;;  %2374 = vmatpush3.bf16.msra.mxu0 %v2605_v12  ;;  %2233 = vmatprep.mubr.msk.f32.mxu0 %vm2549_vm0, %v2550_v4 }
0x134b   :  { %2375 = vmatprep.subr.bf16.mxu0 %v2548_v3 }
0x134e   :  { %2377 = vmatpush3.bf16.msra.mxu0 %v2618_v17 }
0x134f   :  { %2384 = vmatprep.subr.bf16.mxu0 %v2548_v3 }
0x141c   :  { %v1062_v62 = vpop.f32.mrb[18].mxu0 }
0x141d   :  { %v1067_v63 = vadd.f32 %v1062_v62, %v199_v61  ;;  %v2213_v0 = vpop.f32.mrb[19].mxu0  ;;  %v214_v62 = vadd.f32 %v2648_v24, %v2806_v18 }
0x141f   :  { %2475 = vtanh.f32 %v1067_v63  ;;  %v1965_v2 = vmul.f32 -1.442695, %v1067_v63 }
0x1421   :  { %2477 = vpow2.f32 %v1965_v2 }
0x1429   :  { %v2476_v1 = vpop.eup %2475 }
0x142a   :  { %1077 = vrot.lane.b32.xlu0 %v2476_v1, %s2551_s17 }
0x142b   :  { %v2478_v5 = vpop.eup %2477 }
0x142c   :  { %v1071_v6 = vadd.f32 1.0, %v2478_v5 }
0x142e   :  { %2479 = vrcp.f32 %v1071_v6 }
0x1438   :  { %v2480_v7 = vpop.eup %2479 }
0x1439   :  { %v1075_v10 = vmul.f32 %v2480_v7, %v981_v56 }
0x149c   :  { %v1078_v8 = vpop.permute.xlu0 %1077 }
0x149d   :  { %v1080_v9 = vmul.f32 %v2480_v7, %v1078_v8 }
0x149f   :  { %1082 = vrot.lane.b32.xlu1 %v1080_v9, %s2551_s17 }
0x1511   :  { %v1083_v13 = vpop.permute.xlu1 %1082 }
0x1512   :  { %v1085_v11 = vadd.f32 %v1083_v13, %v1075_v10 }
0x1514   :  { %2481 = vtanh.f32 %v1085_v11 }
0x151e   :  { %v2482_v23 = vpop.eup %2481 }
0x151f   :  { %1088 = vrot.lane.b32.xlu0 %v2482_v23, %s2551_s17 }
0x1591   :  { %v1089_v25 = vpop.permute.xlu0 %1088 }
0x1592   :  { %v1091_v26 = vmul.f32 %v2480_v7, %v1089_v25 }
0x1594   :  { %1093 = vrot.lane.b32.xlu1 %v1091_v26, %s2552_s18 }
0x1606   :  { %v1094_v27 = vpop.permute.xlu1 %1093 }
0x1607   :  { %1096 = vst.msk [vmem:[%s3046_s4 + $0x38] sm:$0xff] %vm366_vm2, %v1094_v27  ;;  %2223 = vmatmul.mubr.msk.f32.vlgmr.msra.gmra.mrb[12].mxu1 %vm262_vm4, %v1094_v27 }
0x1608   :  { %1097 = vst.msk [vmem:[%s3046_s4 + $0x40] sm:$0xff] %vm368_vm3, %v1094_v27  ;;  %2380 = vmatpush3.bf16.msra.mxu1 %v2605_v12  ;;  %2244 = vmatprep.mubr.msk.f32.mxu1 %vm2549_vm0, %v2550_v4 }
0x1609   :  { %2381 = vmatprep.subr.bf16.mxu1 %v2548_v3 }
0x160c   :  { %2383 = vmatpush3.bf16.msra.mxu1 %v2618_v17 }
0x160d   :  { %2390 = vmatprep.subr.bf16.mxu1 %v2548_v3 }
0x16da   :  { %v1166_v29 = vpop.f32.mrb[12].mxu1 }
0x16db   :  { %v1171_v30 = vadd.f32 %v1166_v29, %v204_v28  ;;  %v2224_v31 = vpop.f32.mrb[13].mxu1  ;;  %v219_v28 = vadd.f32 %v2804_v16, %v2648_v24 }
0x16dd   :  { %2483 = vtanh.f32 %v1171_v30  ;;  %v1967_v33 = vmul.f32 -1.442695, %v1171_v30 }
0x16df   :  { %2485 = vpow2.f32 %v1967_v33 }
0x16e7   :  { %v2484_v32 = vpop.eup %2483 }
0x16e8   :  { %1181 = vrot.lane.b32.xlu0 %v2484_v32, %s2551_s17 }
0x16e9   :  { %v2486_v34 = vpop.eup %2485 }
0x16ea   :  { %v1175_v35 = vadd.f32 1.0, %v2486_v34 }
0x16ec   :  { %2487 = vrcp.f32 %v1175_v35 }
0x16f6   :  { %v2488_v36 = vpop.eup %2487 }
0x16f7   :  { %v1179_v39 = vmul.f32 %v2488_v36, %v1085_v11 }
0x175a   :  { %v1182_v37 = vpop.permute.xlu0 %1181 }
0x175b   :  { %v1184_v38 = vmul.f32 %v2488_v36, %v1182_v37 }
0x175d   :  { %1186 = vrot.lane.b32.xlu1 %v1184_v38, %s2551_s17 }
0x17cf   :  { %v1187_v40 = vpop.permute.xlu1 %1186 }
0x17d0   :  { %v1189_v15 = vadd.f32 %v1187_v40, %v1179_v39 }
0x17d2   :  { %2489 = vtanh.f32 %v1189_v15 }
0x17dc   :  { %v2490_v41 = vpop.eup %2489 }
0x17dd   :  { %1192 = vrot.lane.b32.xlu0 %v2490_v41, %s2551_s17 }
0x184f   :  { %v1193_v42 = vpop.permute.xlu0 %1192 }
0x1850   :  { %v1195_v43 = vmul.f32 %v2488_v36, %v1193_v42 }
0x1852   :  { %1197 = vrot.lane.b32.xlu1 %v1195_v43, %s2552_s18 }
0x18c4   :  { %v1198_v44 = vpop.permute.xlu1 %1197 }
0x18c5   :  { %1200 = vst.msk [vmem:[%s3046_s4 + $0x40] sm:$0xff] %vm366_vm2, %v1198_v44  ;;  %2234 = vmatmul.mubr.msk.f32.vlgmr.msra.gmra.mrb[20].mxu0 %vm262_vm4, %v1198_v44 }
0x18c6   :  { %1201 = vst.msk [vmem:[%s3046_s4 + $0x38] sm:$0xff] %vm368_vm3, %v1198_v44  ;;  %2386 = vmatpush3.bf16.msra.mxu0 %v2605_v12  ;;  %2255 = vmatprep.mubr.msk.f32.mxu0 %vm2549_vm0, %v2550_v4  ;;  %v224_v44 = vadd.f32 %v2648_v24, %v2810_v20 }
0x18c7   :  { %2387 = vmatprep.subr.bf16.mxu0 %v2548_v3 }
0x18ca   :  { %2389 = vmatpush3.bf16.msra.mxu0 %v2618_v17 }
0x18cb   :  { %2396 = vmatprep.subr.bf16.mxu0 %v2548_v3 }
0x1998   :  { %v1270_v46 = vpop.f32.mrb[20].mxu0 }
0x1999   :  { %v1275_v47 = vadd.f32 %v1270_v46, %v209_v45  ;;  %v2235_v48 = vpop.f32.mrb[21].mxu0 }
0x199b   :  { %2491 = vtanh.f32 %v1275_v47  ;;  %v1969_v50 = vmul.f32 -1.442695, %v1275_v47 }
0x199d   :  { %2493 = vpow2.f32 %v1969_v50 }
0x19a5   :  { %v2492_v49 = vpop.eup %2491 }
0x19a6   :  { %1285 = vrot.lane.b32.xlu0 %v2492_v49, %s2551_s17 }
0x19a7   :  { %v2494_v51 = vpop.eup %2493 }
0x19a8   :  { %v1279_v52 = vadd.f32 1.0, %v2494_v51 }
0x19aa   :  { %2495 = vrcp.f32 %v1279_v52 }
0x19b4   :  { %v2496_v53 = vpop.eup %2495 }
0x19b5   :  { %v1283_v56 = vmul.f32 %v2496_v53, %v1189_v15 }
0x1a18   :  { %v1286_v54 = vpop.permute.xlu0 %1285 }
0x1a19   :  { %v1288_v55 = vmul.f32 %v2496_v53, %v1286_v54 }
0x1a1b   :  { %1290 = vrot.lane.b32.xlu1 %v1288_v55, %s2551_s17 }
0x1a8d   :  { %v1291_v57 = vpop.permute.xlu1 %1290 }
0x1a8e   :  { %v1293_v14 = vadd.f32 %v1291_v57, %v1283_v56 }
0x1a90   :  { %2497 = vtanh.f32 %v1293_v14 }
0x1a9a   :  { %v2498_v58 = vpop.eup %2497 }
0x1a9b   :  { %1296 = vrot.lane.b32.xlu0 %v2498_v58, %s2551_s17 }
0x1b0d   :  { %v1297_v59 = vpop.permute.xlu0 %1296 }
0x1b0e   :  { %v1299_v60 = vmul.f32 %v2496_v53, %v1297_v59 }
0x1b10   :  { %1301 = vrot.lane.b32.xlu1 %v1299_v60, %s2552_s18  ;;  %v229_v60 = vadd.f32 %v2808_v19, %v2648_v24 }
0x1b82   :  { %v1302_v61 = vpop.permute.xlu1 %1301 }
0x1b83   :  { %1304 = vst.msk [vmem:[%s3046_s4 + $0x48] sm:$0xff] %vm366_vm2, %v1302_v61  ;;  %2245 = vmatmul.mubr.msk.f32.vlgmr.msra.gmra.mrb[14].mxu1 %vm262_vm4, %v1302_v61 }
0x1b84   :  { %1305 = vst.msk [vmem:[%s3046_s4 + $0x30] sm:$0xff] %vm368_vm3, %v1302_v61  ;;  %2392 = vmatpush3.bf16.msra.mxu1 %v2605_v12  ;;  %2266 = vmatprep.mubr.msk.f32.mxu1 %vm2549_vm0, %v2550_v4 }
0x1b85   :  { %2393 = vmatprep.subr.bf16.mxu1 %v2548_v3 }
0x1b88   :  { %2395 = vmatpush3.bf16.msra.mxu1 %v2618_v17 }
0x1b89   :  { %2402 = vmatprep.subr.bf16.mxu1 %v2548_v3 }
0x1c56   :  { %v1374_v63 = vpop.f32.mrb[14].mxu1 }
0x1c57   :  { %v1379_v0 = vadd.f32 %v1374_v63, %v214_v62  ;;  %v2246_v1 = vpop.f32.mrb[15].mxu1 }
0x1c59   :  { %2499 = vtanh.f32 %v1379_v0  ;;  %v1971_v5 = vmul.f32 -1.442695, %v1379_v0 }
0x1c5b   :  { %2501 = vpow2.f32 %v1971_v5 }
0x1c63   :  { %v2500_v2 = vpop.eup %2499 }
0x1c64   :  { %1389 = vrot.lane.b32.xlu0 %v2500_v2, %s2551_s17 }
0x1c65   :  { %v2502_v6 = vpop.eup %2501 }
0x1c66   :  { %v1383_v7 = vadd.f32 1.0, %v2502_v6 }
0x1c68   :  { %2503 = vrcp.f32 %v1383_v7 }
0x1c72   :  { %v2504_v8 = vpop.eup %2503 }
0x1c73   :  { %v1387_v13 = vmul.f32 %v2504_v8, %v1293_v14 }
0x1cd6   :  { %v1390_v9 = vpop.permute.xlu0 %1389 }
0x1cd7   :  { %v1392_v10 = vmul.f32 %v2504_v8, %v1390_v9 }
0x1cd9   :  { %1394 = vrot.lane.b32.xlu1 %v1392_v10, %s2551_s17  ;;  %v2547_v10 = vld [vmem:[%s3045_s3] ss:$0 sm:$0xff] }
0x1d4b   :  { %v1395_v11 = vpop.permute.xlu1 %1394 }
0x1d4c   :  { %v1397_v18 = vadd.f32 %v1395_v11, %v1387_v13  ;;  %v234_v13 = vadd.f32 %v2547_v10, %v2814_v22 }
0x1d4e   :  { %2505 = vtanh.f32 %v1397_v18 }
0x1d58   :  { %v2506_v23 = vpop.eup %2505 }
0x1d59   :  { %1400 = vrot.lane.b32.xlu0 %v2506_v23, %s2551_s17 }
0x1dcb   :  { %v1401_v25 = vpop.permute.xlu0 %1400 }
0x1dcc   :  { %v1403_v26 = vmul.f32 %v2504_v8, %v1401_v25 }
0x1dce   :  { %1405 = vrot.lane.b32.xlu1 %v1403_v26, %s2552_s18 }
0x1e40   :  { %v1406_v27 = vpop.permute.xlu1 %1405 }
0x1e41   :  { %1408 = vst.msk [vmem:[%s3046_s4 + $0x50] sm:$0xff] %vm366_vm2, %v1406_v27  ;;  %2256 = vmatmul.mubr.msk.f32.vlgmr.msra.gmra.mrb[22].mxu0 %vm262_vm4, %v1406_v27 }
0x1e42   :  { %1409 = vst.msk [vmem:[%s3046_s4 + $0x28] sm:$0xff] %vm368_vm3, %v1406_v27  ;;  %2398 = vmatpush3.bf16.msra.mxu0 %v2605_v12  ;;  %2277 = vmatprep.mubr.msk.f32.mxu0 %vm2549_vm0, %v2550_v4 }
0x1e43   :  { %2399 = vmatprep.subr.bf16.mxu0 %v2548_v3 }
0x1e46   :  { %2401 = vmatpush3.bf16.msra.mxu0 %v2618_v17 }
0x1e47   :  { %2408 = vmatprep.subr.bf16.mxu0 %v2548_v3 }
0x1f14   :  { %v1478_v29 = vpop.f32.mrb[22].mxu0 }
0x1f15   :  { %v1483_v30 = vadd.f32 %v1478_v29, %v219_v28  ;;  %v2257_v31 = vpop.f32.mrb[23].mxu0 }
0x1f17   :  { %2507 = vtanh.f32 %v1483_v30  ;;  %v1973_v33 = vmul.f32 -1.442695, %v1483_v30 }
0x1f19   :  { %2509 = vpow2.f32 %v1973_v33 }
0x1f21   :  { %v2508_v32 = vpop.eup %2507 }
0x1f22   :  { %1493 = vrot.lane.b32.xlu0 %v2508_v32, %s2551_s17 }
0x1f23   :  { %v2510_v34 = vpop.eup %2509 }
0x1f24   :  { %v1487_v35 = vadd.f32 1.0, %v2510_v34 }
0x1f26   :  { %2511 = vrcp.f32 %v1487_v35 }
0x1f30   :  { %v2512_v36 = vpop.eup %2511 }
0x1f31   :  { %v1491_v39 = vmul.f32 %v2512_v36, %v1397_v18 }
0x1f94   :  { %v1494_v37 = vpop.permute.xlu0 %1493 }
0x1f95   :  { %v1496_v38 = vmul.f32 %v2512_v36, %v1494_v37 }
0x1f97   :  { %1498 = vrot.lane.b32.xlu1 %v1496_v38, %s2551_s17  ;;  %v239_v38 = vadd.f32 %v2547_v10, %v2812_v21 }
0x2009   :  { %v1499_v40 = vpop.permute.xlu1 %1498 }
0x200a   :  { %v1501_v16 = vadd.f32 %v1499_v40, %v1491_v39 }
0x200c   :  { %2513 = vtanh.f32 %v1501_v16 }
0x2016   :  { %v2514_v15 = vpop.eup %2513 }
0x2017   :  { %1504 = vrot.lane.b32.xlu0 %v2514_v15, %s2551_s17 }
0x2089   :  { %v1505_v41 = vpop.permute.xlu0 %1504 }
0x208a   :  { %v1507_v42 = vmul.f32 %v2512_v36, %v1505_v41 }
0x208c   :  { %1509 = vrot.lane.b32.xlu1 %v1507_v42, %s2552_s18 }
0x20fe   :  { %v1510_v43 = vpop.permute.xlu1 %1509 }
0x20ff   :  { %1512 = vst.msk [vmem:[%s3046_s4 + $0x58] sm:$0xff] %vm366_vm2, %v1510_v43  ;;  %2267 = vmatmul.mubr.msk.f32.vlgmr.msra.gmra.mrb[16].mxu1 %vm262_vm4, %v1510_v43 }
0x2100   :  { %1513 = vst.msk [vmem:[%s3046_s4 + $0x20] sm:$0xff] %vm368_vm3, %v1510_v43  ;;  %2404 = vmatpush3.bf16.msra.mxu1 %v2605_v12  ;;  %2288 = vmatprep.mubr.msk.f32.mxu1 %vm2549_vm0, %v2550_v4 }
0x2101   :  { %2405 = vmatprep.subr.bf16.mxu1 %v2548_v3 }
0x2104   :  { %2407 = vmatpush3.bf16.msra.mxu1 %v2618_v17 }
0x21d2   :  { %v1582_v45 = vpop.f32.mrb[16].mxu1 }
0x21d3   :  { %v1587_v46 = vadd.f32 %v1582_v45, %v224_v44  ;;  %v2268_v47 = vpop.f32.mrb[17].mxu1 }
0x21d5   :  { %2515 = vtanh.f32 %v1587_v46  ;;  %v1975_v49 = vmul.f32 -1.442695, %v1587_v46 }
0x21d7   :  { %2517 = vpow2.f32 %v1975_v49 }
0x21df   :  { %v2516_v48 = vpop.eup %2515 }
0x21e0   :  { %1597 = vrot.lane.b32.xlu0 %v2516_v48, %s2551_s17 }
0x21e1   :  { %v2518_v50 = vpop.eup %2517 }
0x21e2   :  { %v1591_v51 = vadd.f32 1.0, %v2518_v50 }
0x21e4   :  { %2519 = vrcp.f32 %v1591_v51 }
0x21ee   :  { %v2520_v52 = vpop.eup %2519 }
0x21ef   :  { %v1595_v55 = vmul.f32 %v2520_v52, %v1501_v16 }
0x2252   :  { %v1598_v53 = vpop.permute.xlu0 %1597 }
0x2253   :  { %v1600_v54 = vmul.f32 %v2520_v52, %v1598_v53 }
0x2255   :  { %1602 = vrot.lane.b32.xlu1 %v1600_v54, %s2551_s17 }
0x22c7   :  { %v1603_v56 = vpop.permute.xlu1 %1602 }
0x22c8   :  { %v1605_v20 = vadd.f32 %v1603_v56, %v1595_v55 }
0x22ca   :  { %2521 = vtanh.f32 %v1605_v20 }
0x22d4   :  { %v2522_v57 = vpop.eup %2521 }
0x22d5   :  { %1608 = vrot.lane.b32.xlu0 %v2522_v57, %s2551_s17 }
0x2347   :  { %v1609_v14 = vpop.permute.xlu0 %1608 }
0x2348   :  { %v1611_v58 = vmul.f32 %v2520_v52, %v1609_v14 }
0x234a   :  { %1613 = vrot.lane.b32.xlu1 %v1611_v58, %s2552_s18 }
0x23bc   :  { %v1614_v59 = vpop.permute.xlu1 %1613 }
0x23bd   :  { %1616 = vst.msk [vmem:[%s3046_s4 + $0x60] sm:$0xff] %vm366_vm2, %v1614_v59  ;;  %2278 = vmatmul.mubr.msk.f32.vlgmr.msra.gmra.mrb[24].mxu0 %vm262_vm4, %v1614_v59 }
0x23be   :  { %1617 = vst.msk [vmem:[%s3046_s4 + $0x18] sm:$0xff] %vm368_vm3, %v1614_v59  ;;  %2410 = vmatpush3.bf16.msra.mxu0 %v2605_v12  ;;  %2299 = vmatprep.mubr.msk.f32.mxu0 %vm2549_vm0, %v2550_v4 }
0x23bf   :  { %2411 = vmatprep.subr.bf16.mxu0 %v2548_v3 }
0x23c2   :  { %2413 = vmatpush3.bf16.msra.mxu0 %v2618_v17 }
0x2490   :  { %v1686_v61 = vpop.f32.mrb[24].mxu0 }
0x2491   :  { %v1691_v62 = vadd.f32 %v1686_v61, %v229_v60  ;;  %v2279_v63 = vpop.f32.mrb[25].mxu0 }
0x2493   :  { %2523 = vtanh.f32 %v1691_v62  ;;  %v1977_v1 = vmul.f32 -1.442695, %v1691_v62 }
0x2495   :  { %2525 = vpow2.f32 %v1977_v1 }
0x249d   :  { %v2524_v0 = vpop.eup %2523 }
0x249e   :  { %1701 = vrot.lane.b32.xlu0 %v2524_v0, %s2551_s17 }
0x249f   :  { %v2526_v12 = vpop.eup %2525 }
0x24a0   :  { %v1695_v2 = vadd.f32 1.0, %v2526_v12 }
0x24a2   :  { %2527 = vrcp.f32 %v1695_v2 }
0x24ac   :  { %v2528_v4 = vpop.eup %2527 }
0x24ad   :  { %v1699_v17 = vmul.f32 %v2528_v4, %v1605_v20 }
0x2510   :  { %v1702_v5 = vpop.permute.xlu0 %1701 }
0x2511   :  { %v1704_v3 = vmul.f32 %v2528_v4, %v1702_v5 }
0x2513   :  { %1706 = vrot.lane.b32.xlu1 %v1704_v3, %s2551_s17 }
0x2585   :  { %v1707_v6 = vpop.permute.xlu1 %1706 }
0x2586   :  { %v1709_v24 = vadd.f32 %v1707_v6, %v1699_v17 }
0x2588   :  { %2529 = vtanh.f32 %v1709_v24 }
0x2592   :  { %v2530_v19 = vpop.eup %2529 }
0x2593   :  { %1712 = vrot.lane.b32.xlu0 %v2530_v19, %s2551_s17 }
0x2605   :  { %v1713_v7 = vpop.permute.xlu0 %1712 }
0x2606   :  { %v1715_v8 = vmul.f32 %v2528_v4, %v1713_v7 }
0x2608   :  { %1717 = vrot.lane.b32.xlu1 %v1715_v8, %s2552_s18 }
0x267a   :  { %v1718_v9 = vpop.permute.xlu1 %1717 }
0x267b   :  { %1720 = vst.msk [vmem:[%s3046_s4 + $0x68] sm:$0xff] %vm366_vm2, %v1718_v9  ;;  %2289 = vmatmul.mubr.msk.f32.vlgmr.msra.gmra.mrb[18].mxu1 %vm262_vm4, %v1718_v9 }
0x267c   :  { %1721 = vst.msk [vmem:[%s3046_s4 + $0x10] sm:$0xff] %vm368_vm3, %v1718_v9 }
0x274e   :  { %v1790_v11 = vpop.f32.mrb[18].mxu1 }
0x274f   :  { %v1795_v18 = vadd.f32 %v1790_v11, %v234_v13  ;;  %v2290_v23 = vpop.f32.mrb[19].mxu1 }
0x2751   :  { %2531 = vtanh.f32 %v1795_v18  ;;  %v1979_v26 = vmul.f32 -1.442695, %v1795_v18 }
0x2753   :  { %2533 = vpow2.f32 %v1979_v26 }
0x275b   :  { %v2532_v25 = vpop.eup %2531 }
0x275c   :  { %1805 = vrot.lane.b32.xlu0 %v2532_v25, %s2551_s17 }
0x275d   :  { %v2534_v27 = vpop.eup %2533 }
0x275e   :  { %v1799_v28 = vadd.f32 1.0, %v2534_v27 }
0x2760   :  { %2535 = vrcp.f32 %v1799_v28 }
0x276a   :  { %v2536_v29 = vpop.eup %2535 }
0x276b   :  { %v1803_v32 = vmul.f32 %v2536_v29, %v1709_v24 }
0x27ce   :  { %v1806_v30 = vpop.permute.xlu0 %1805 }
0x27cf   :  { %v1808_v31 = vmul.f32 %v2536_v29, %v1806_v30 }
0x27d1   :  { %1810 = vrot.lane.b32.xlu1 %v1808_v31, %s2551_s17 }
0x2843   :  { %v1811_v33 = vpop.permute.xlu1 %1810 }
0x2844   :  { %v1813_v22 = vadd.f32 %v1811_v33, %v1803_v32 }
0x2846   :  { %2537 = vtanh.f32 %v1813_v22 }
0x2850   :  { %v2538_v34 = vpop.eup %2537 }
0x2851   :  { %1816 = vrot.lane.b32.xlu0 %v2538_v34, %s2551_s17 }
0x28c3   :  { %v1817_v35 = vpop.permute.xlu0 %1816 }
0x28c4   :  { %v1819_v36 = vmul.f32 %v2536_v29, %v1817_v35 }
0x28c6   :  { %1821 = vrot.lane.b32.xlu1 %v1819_v36, %s2552_s18 }
0x2938   :  { %v1822_v37 = vpop.permute.xlu1 %1821 }
0x2939   :  { %1824 = vst.msk [vmem:[%s3046_s4 + $0x70] sm:$0xff] %vm366_vm2, %v1822_v37  ;;  %2300 = vmatmul.mubr.msk.f32.vlgmr.msra.gmra.mrb[26].mxu0 %vm262_vm4, %v1822_v37 }
0x293a   :  { %1825 = vst.msk [vmem:[%s3046_s4 + $0x8] sm:$0xff] %vm368_vm3, %v1822_v37 }
0x2a0c   :  { %v1894_v39 = vpop.f32.mrb[26].mxu0 }
0x2a0d   :  { %v1899_v40 = vadd.f32 %v1894_v39, %v239_v38  ;;  %v2301_v16 = vpop.f32.mrb[27].mxu0 }
0x2a0f   :  { %2539 = vtanh.f32 %v1899_v40  ;;  %v1981_v41 = vmul.f32 -1.442695, %v1899_v40 }
0x2a11   :  { %2541 = vpow2.f32 %v1981_v41 }
0x2a19   :  { %v2540_v15 = vpop.eup %2539 }
0x2a1a   :  { %1909 = vrot.lane.b32.xlu0 %v2540_v15, %s2551_s17 }
0x2a1b   :  { %v2542_v42 = vpop.eup %2541 }
0x2a1c   :  { %v1903_v43 = vadd.f32 1.0, %v2542_v42 }
0x2a1e   :  { %2543 = vrcp.f32 %v1903_v43 }
0x2a28   :  { %v2544_v44 = vpop.eup %2543 }
0x2a29   :  { %v1907_v47 = vmul.f32 %v2544_v44, %v1813_v22 }
0x2a8c   :  { %v1910_v45 = vpop.permute.xlu0 %1909 }
0x2a8d   :  { %v1912_v46 = vmul.f32 %v2544_v44, %v1910_v45 }
0x2a8f   :  { %1914 = vrot.lane.b32.xlu1 %v1912_v46, %s2551_s17 }
0x2b01   :  { %v1915_v48 = vpop.permute.xlu1 %1914 }
0x2b02   :  { %v1917_v21 = vadd.f32 %v1915_v48, %v1907_v47 }
0x2b04   :  { %2545 = vtanh.f32 %v1917_v21 }
0x2b0e   :  { %v2546_v49 = vpop.eup %2545 }
0x2b0f   :  { %1920 = vrot.lane.b32.xlu0 %v2546_v49, %s2551_s17 }
0x2b81   :  { %v1921_v50 = vpop.permute.xlu0 %1920 }
0x2b82   :  { %v1923_v51 = vmul.f32 %v2544_v44, %v1921_v50 }
0x2b84   :  { %1925 = vrot.lane.b32.xlu1 %v1923_v51, %s2552_s18 }
0x2bf6   :  { %v1926_v52 = vpop.permute.xlu1 %1925 }
0x2bf7   :  { %1928 = vst.msk [vmem:[%s3046_s4 + $0x78] sm:$0xff] %vm366_vm2, %v1926_v52 }
0x2bf8   :  { %1929 = vst.msk [vmem:[%s3046_s4] sm:$0xff] %vm368_vm3, %v1926_v52 }

</bundles_post_ra>
